<compile_context>
chip_gen: v5e
topology: v5e:2x2
jax: 0.10.0
libtpu: 0.0.40
codegen_flags: <defaults>
</compile_context>

<pallas_src>
import math
import functools

import jax
import jax.numpy as jnp
from jax import lax
from jax.experimental import pallas as pl
from jax.experimental.pallas import tpu as pltpu

_INV_SQRT2 = 1.0 / math.sqrt(2.0)
_LN_EPS = 1e-5


def _largest_divisor_leq(n, k):
    """Largest divisor of n that is <= k (so batch blocking never needs padding)."""
    k = max(1, min(n, k))
    while n % k:
        k -= 1
    return k


def _vmem_limit_bytes(estimate_bytes):
    """Generation-aware scoped-VMEM request.

    Perf feedback: ~100 MiB is usable on the 128-MiB v5e/v6e parts; stay conservative
    (<= 48 MiB) on v7x's 64-MiB VMEM so the compiler keeps full pipelining depth.
    """
    cap = 48 << 20
    try:
        phys = pltpu.get_tpu_info().vmem_capacity_bytes
        cap = int(min(100 << 20, (phys * 3) // 4))
    except Exception:
        pass
    return int(min(max(2 * estimate_bytes, 32 << 20), cap))


def _layer_norm_f32(x, gamma, beta, eps):
    mu = jnp.mean(x, axis=-1, keepdims=True)
    xc = x - mu
    var = jnp.mean(xc * xc, axis=-1, keepdims=True)
    return xc * lax.rsqrt(var + eps) * gamma + beta


# --------------------------------------------------------------------------- #
# Fused Block kernel: LN1 -> MHA -> +res -> LN2 -> MLP -> +res, per batch block
# --------------------------------------------------------------------------- #
def block_kernel(x_ref, g1_ref, be1_ref, wqkv_ref, wp_ref, bp_ref,
                 g2_ref, be2_ref, w1_ref, b1_ref, w2_ref, b2_ref, o_ref,
                 *, num_heads, scale, eps, gelu_approx):
    bb, n, c = x_ref.shape
    dh = c // num_heads
    x = x_ref[...].astype(jnp.float32).reshape(bb * n, c)        # f32 residual stream

    # ---- norm1 + fused QKV projection: one lane-dense matmul, output width 3C ----
    xn = _layer_norm_f32(x, g1_ref[...], be1_ref[...], eps).astype(wqkv_ref.dtype)
    qkv = jnp.dot(xn, wqkv_ref[...], preferred_element_type=jnp.float32)   # (bb*N, 3C)

    # ---- per (batch, head) softmax attention ------------------------------------
    # Heads read static lane slices of the fused qkv slab; per-head (N, dh) outputs
    # are concatenated back into an (N, C) slab so the output projection is a single
    # K=C contraction instead of H rank-dh updates.
    # TODO(synk): for large head counts (H >= 12) move heads onto a fori_loop / grid
    # axis to bound vreg live ranges; unrolled here (H is small in this demo).
    # TODO(synk): for N >> 256 replace this whole-sequence body with a flash-style
    # KV-tiled online-softmax loop (VMEM for the (N, N) scores grows quadratically).
    o_parts = []
    for b in range(bb):
        r0, r1 = b * n, (b + 1) * n
        heads = []
        for h in range(num_heads):
            q = qkv[r0:r1, h * dh:(h + 1) * dh]
            k = qkv[r0:r1, c + h * dh:c + (h + 1) * dh]
            v = qkv[r0:r1, 2 * c + h * dh:2 * c + (h + 1) * dh]
            s = lax.dot_general(q, k, (((1,), (1,)), ((), ())),
                                preferred_element_type=jnp.float32) * scale   # (N, N)
            s = s - jnp.max(s, axis=-1, keepdims=True)
            p = jnp.exp(s)
            p = p * pl.reciprocal(jnp.sum(p, axis=-1, keepdims=True), approx=True)
            heads.append(jnp.dot(p, v, preferred_element_type=jnp.float32))  # (N, dh)
        o_parts.append(jnp.concatenate(heads, axis=-1))                      # (N, C)
    o_all = o_parts[0] if bb == 1 else jnp.concatenate(o_parts, axis=0)      # (bb*N, C)

    # ---- single lane-dense output projection (contraction K = C) + residual -----
    x1 = x + jnp.dot(o_all.astype(wp_ref.dtype), wp_ref[...],
                     preferred_element_type=jnp.float32) + bp_ref[...]

    # ---- norm2 + MLP (fc1 -> GELU -> fc2) + residual, fused in the same kernel ---
    hn = _layer_norm_f32(x1, g2_ref[...], be2_ref[...], eps).astype(w1_ref.dtype)
    h = jnp.dot(hn, w1_ref[...], preferred_element_type=jnp.float32) + b1_ref[...]
    if gelu_approx:
        h = jax.nn.gelu(h, approximate=True)     # opt-in tanh path (EUP) for VALU-bound v5e
    else:
        h = 0.5 * h * (1.0 + lax.erf(h * _INV_SQRT2))   # exact erf GELU (nn.GELU default)
    y = jnp.dot(h.astype(w2_ref.dtype), w2_ref[...],
                preferred_element_type=jnp.float32) + b2_ref[...]

    # TODO(synk): attn_drop / proj_drop / mlp drops / DropPath / LayerScale are identity
    # under the Block defaults (drop=0, attn_drop=0, drop_path=0, init_values=None).
    o_ref[...] = (x1 + y).reshape(bb, n, c).astype(o_ref.dtype)


def block_forward(x, kp, *, num_heads, batch_block=1, eps=_LN_EPS, gelu_approx=False):
    B, N, C = x.shape
    dh = C // num_heads
    Dh = kp["w1"].shape[1]
    wbytes = jnp.dtype(kp["wqkv"].dtype).itemsize
    bb = _largest_divisor_leq(B, batch_block)       # always divides B -> no padding
    grid = (B // bb,)

    kernel = functools.partial(block_kernel, num_heads=num_heads, scale=dh ** -0.5,
                               eps=eps, gelu_approx=gelu_approx)

    cost = pl.CostEstimate(
        flops=int(B * N * (6 * C * C + 4 * N * C + 2 * C * C + 4 * C * Dh)),
        transcendentals=int(B * (num_heads * N * N + N * Dh + 4 * N)),
        bytes_accessed=int(2 * B * N * C * 4 + (4 * C * C + 2 * C * Dh) * wbytes
                           + 8 * C * 4 + Dh * 4),
    )
    weight_bytes = (4 * C * C + 2 * C * Dh) * wbytes
    est = (2 * 2 * bb * N * C * 4                 # x / out blocks, double-buffered
           + 2 * weight_bytes                     # resident weights (default double buffer)
           + bb * N * (3 * C + Dh + 2 * C) * 4    # qkv + fc1 + misc f32 intermediates
           + 16 * C * 4)
    # TODO(synk): pipeline_mode=pl.Buffered(1) on the constant-index weight operands
    # would halve their resident footprint at ViT-B scale; kept at the default double
    # buffer here for lowering robustness.
    return pl.pallas_call(
        kernel,
        out_shape=jax.ShapeDtypeStruct((B, N, C), x.dtype),
        grid_spec=pltpu.PrefetchScalarGridSpec(
            num_scalar_prefetch=0,
            grid=grid,
            in_specs=[
                pl.BlockSpec((bb, N, C), lambda i: (i, 0, 0)),   # x batch block
                pl.BlockSpec((1, C), lambda i: (0, 0)),          # norm1 gamma
                pl.BlockSpec((1, C), lambda i: (0, 0)),          # norm1 beta
                pl.BlockSpec((C, 3 * C), lambda i: (0, 0)),      # fused Wqkv (lane dense)
                pl.BlockSpec((C, C), lambda i: (0, 0)),          # Wproj
                pl.BlockSpec((1, C), lambda i: (0, 0)),          # proj bias
                pl.BlockSpec((1, C), lambda i: (0, 0)),          # norm2 gamma
                pl.BlockSpec((1, C), lambda i: (0, 0)),          # norm2 beta
                pl.BlockSpec((C, Dh), lambda i: (0, 0)),         # W1
                pl.BlockSpec((1, Dh), lambda i: (0, 0)),         # b1
                pl.BlockSpec((Dh, C), lambda i: (0, 0)),         # W2
                pl.BlockSpec((1, C), lambda i: (0, 0)),          # b2
            ],
            out_specs=pl.BlockSpec((bb, N, C), lambda i: (i, 0, 0)),
        ),
        compiler_params=pltpu.CompilerParams(
            dimension_semantics=("parallel",),
            vmem_limit_bytes=_vmem_limit_bytes(est),
        ),
        cost_estimate=cost,
    )(x, kp["g1"], kp["be1"], kp["wqkv"], kp["wp"], kp["bp"],
      kp["g2"], kp["be2"], kp["w1"], kp["b1"], kp["w2"], kp["b2"])


# --------------------------------------------------------------------------- #
# Parameters (f32 masters, torch-Linear weights pre-transposed to (in, out))   #
# --------------------------------------------------------------------------- #
def init_block_params(key, dim, num_heads, mlp_ratio=4.0):
    hidden = int(dim * mlp_ratio)
    ks = jax.random.split(key, 11)
    bd = 1.0 / math.sqrt(dim)
    bh = 1.0 / math.sqrt(hidden)
    u = lambda k, shape, b: jax.random.uniform(k, shape, jnp.float32, -b, b)
    return dict(
        g1=1.0 + 0.1 * jax.random.normal(ks[0], (dim,), jnp.float32),
        be1=0.1 * jax.random.normal(ks[1], (dim,), jnp.float32),
        wqkv=u(ks[2], (dim, 3 * dim), bd),      # qkv_bias=False (Block default)
        wproj=u(ks[3], (dim, dim), bd),
        bproj=u(ks[4], (dim,), bd),
        g2=1.0 + 0.1 * jax.random.normal(ks[5], (dim,), jnp.float32),
        be2=0.1 * jax.random.normal(ks[6], (dim,), jnp.float32),
        w1=u(ks[7], (dim, hidden), bd),
        b1=u(ks[8], (hidden,), bd),
        w2=u(ks[9], (hidden, dim), bh),
        b2=u(ks[10], (dim,), bh),
    )


def prepare_block_params(p, mxu_dtype=jnp.bfloat16):
    """Cast masters into kernel-ready layouts (bf16 MXU operands, f32 LN/bias params).

    Wqkv stays (C, 3C) with columns [q | k | v], each head-major (torch feature order),
    so the kernel's static lane slices pick out head h directly from the fused output.
    """
    # TODO(synk): on v7x the MXU also supports fp8 operands (2x throughput, half the
    # resident weight VMEM); bf16 kept here for portability to v5e/v6e.
    dim = p["wproj"].shape[0]
    hidden = p["w1"].shape[1]
    return dict(
        g1=p["g1"].reshape(1, dim), be1=p["be1"].reshape(1, dim),
        wqkv=p["wqkv"].astype(mxu_dtype),
        wp=p["wproj"].astype(mxu_dtype),
        bp=p["bproj"].reshape(1, dim),
        g2=p["g2"].reshape(1, dim), be2=p["be2"].reshape(1, dim),
        w1=p["w1"].astype(mxu_dtype), b1=p["b1"].reshape(1, hidden),
        w2=p["w2"].astype(mxu_dtype), b2=p["b2"].reshape(1, dim),
    )


# --------------------------------------------------------------------------- #
# Pure-JAX f32 reference (Block.forward semantics)                             #
# --------------------------------------------------------------------------- #
def block_reference(x, p, num_heads, eps=_LN_EPS):
    def ln(t, g, b):
        mu = t.mean(-1, keepdims=True)
        var = ((t - mu) ** 2).mean(-1, keepdims=True)
        return (t - mu) / jnp.sqrt(var + eps) * g + b

    B, N, C = x.shape
    dh = C // num_heads
    h = ln(x, p["g1"], p["be1"])
    qkv = h @ p["wqkv"]
    q, k, v = jnp.split(qkv, 3, axis=-1)
    split = lambda t: t.reshape(B, N, num_heads, dh).transpose(0, 2, 1, 3)
    q, k, v = split(q), split(k), split(v)
    attn = jax.nn.softmax((q @ jnp.swapaxes(k, -1, -2)) * dh ** -0.5, axis=-1)
    o = (attn @ v).transpose(0, 2, 1, 3).reshape(B, N, C)
    x = x + o @ p["wproj"] + p["bproj"]
    h = ln(x, p["g2"], p["be2"])
    h = h @ p["w1"] + p["b1"]
    h = 0.5 * h * (1.0 + lax.erf(h * _INV_SQRT2))
    return x + h @ p["w2"] + p["b2"]


if __name__ == "__main__":
    # Small ViT-like Block: batch=2, seq=8, dim=128 (lane-dense), heads=4, mlp_ratio=4.
    B, N, DIM, HEADS, MLP_RATIO = 2, 8, 128, 4, 4.0

    key = jax.random.PRNGKey(0)
    kx, kp = jax.random.split(key)
    x = jax.random.normal(kx, (B, N, DIM), jnp.float32)

    masters = init_block_params(kp, DIM, HEADS, MLP_RATIO)
    kparams = prepare_block_params(masters, mxu_dtype=jnp.bfloat16)

    # batch_block=1 keeps grid=(B,) so both v7x TensorCores get work at B=2; raise it
    # for large-batch workloads to amortize the ~0.35 us per-grid-step overhead.
    y = block_forward(x, kparams, num_heads=HEADS, batch_block=1)
    y = jax.block_until_ready(y)

    y_ref = block_reference(x, masters, HEADS)
    assert y.shape == (B, N, DIM)
    # bf16 MXU operands (f32 accumulation) + approx softmax reciprocal vs f32 reference
    # -> loosened tolerance; the bf16 cast of LN outputs is the dominant error source.
    max_err = float(jnp.max(jnp.abs(y - y_ref)))
    assert max_err < 5e-2, f"mismatch vs reference: max abs err {max_err}"

    print("KERNEL_OK")
</pallas_src>

<mosaic_0001>
module attributes {stable_mosaic.version = 11 : i64} {
  func.func @block_kernel(%arg0: i32, %arg1: memref<1x8x128xf32, #tpu.memory_space<vmem>>, %arg2: memref<1x128xf32, #tpu.memory_space<vmem>>, %arg3: memref<1x128xf32, #tpu.memory_space<vmem>>, %arg4: memref<128x384xbf16, #tpu.memory_space<vmem>>, %arg5: memref<128x128xbf16, #tpu.memory_space<vmem>>, %arg6: memref<1x128xf32, #tpu.memory_space<vmem>>, %arg7: memref<1x128xf32, #tpu.memory_space<vmem>>, %arg8: memref<1x128xf32, #tpu.memory_space<vmem>>, %arg9: memref<128x512xbf16, #tpu.memory_space<vmem>>, %arg10: memref<1x512xf32, #tpu.memory_space<vmem>>, %arg11: memref<512x128xbf16, #tpu.memory_space<vmem>>, %arg12: memref<1x128xf32, #tpu.memory_space<vmem>>, %arg13: memref<1x8x128xf32, #tpu.memory_space<vmem>>) attributes {dimension_semantics = [#tpu.dimension_semantics<parallel>], iteration_bounds = array<i64: 2>, scalar_prefetch = 0 : i64, scratch_operands = 0 : i64, tpu.core_type = #tpu.core_type<tc>, window_params = [{transform_indices = @transform_0, window_bounds = array<i64: 1, 8, 128>}, {pipeline_mode = #tpu.pipeline_mode<synchronous>, transform_indices = @transform_1, window_bounds = array<i64: 1, 128>}, {pipeline_mode = #tpu.pipeline_mode<synchronous>, transform_indices = @transform_2, window_bounds = array<i64: 1, 128>}, {pipeline_mode = #tpu.pipeline_mode<synchronous>, transform_indices = @transform_3, window_bounds = array<i64: 128, 384>}, {pipeline_mode = #tpu.pipeline_mode<synchronous>, transform_indices = @transform_4, window_bounds = array<i64: 128, 128>}, {pipeline_mode = #tpu.pipeline_mode<synchronous>, transform_indices = @transform_5, window_bounds = array<i64: 1, 128>}, {pipeline_mode = #tpu.pipeline_mode<synchronous>, transform_indices = @transform_6, window_bounds = array<i64: 1, 128>}, {pipeline_mode = #tpu.pipeline_mode<synchronous>, transform_indices = @transform_7, window_bounds = array<i64: 1, 128>}, {pipeline_mode = #tpu.pipeline_mode<synchronous>, transform_indices = @transform_8, window_bounds = array<i64: 128, 512>}, {pipeline_mode = #tpu.pipeline_mode<synchronous>, transform_indices = @transform_9, window_bounds = array<i64: 1, 512>}, {pipeline_mode = #tpu.pipeline_mode<synchronous>, transform_indices = @transform_10, window_bounds = array<i64: 512, 128>}, {pipeline_mode = #tpu.pipeline_mode<synchronous>, transform_indices = @transform_11, window_bounds = array<i64: 1, 128>}, {transform_indices = @transform_12, window_bounds = array<i64: 1, 8, 128>}]} {
    %c0 = arith.constant 0 : index
    %c0_0 = arith.constant 0 : index
    %c0_1 = arith.constant 0 : index
    %0 = vector.load %arg1[%c0, %c0_0, %c0_1] : memref<1x8x128xf32, #tpu.memory_space<vmem>>, vector<1x8x128xf32>
    %1 = vector.shape_cast %0 : vector<1x8x128xf32> to vector<8x128xf32>
    %c0_2 = arith.constant 0 : index
    %c0_3 = arith.constant 0 : index
    %2 = vector.load %arg2[%c0_2, %c0_3] : memref<1x128xf32, #tpu.memory_space<vmem>>, vector<1x128xf32>
    %c0_4 = arith.constant 0 : index
    %c0_5 = arith.constant 0 : index
    %3 = vector.load %arg3[%c0_4, %c0_5] : memref<1x128xf32, #tpu.memory_space<vmem>>, vector<1x128xf32>
    %cst = arith.constant dense<0.000000e+00> : vector<8xf32>
    %4 = vector.multi_reduction <add>, %1, %cst [1] : vector<8x128xf32> to vector<8xf32>
    %5 = vector.shape_cast %4 : vector<8xf32> to vector<8x1xf32>
    %cst_6 = arith.constant 1.280000e+02 : f32
    %6 = vector.broadcast %cst_6 : f32 to vector<8x1xf32>
    %7 = arith.divf %5, %6 : vector<8x1xf32>
    %8 = vector.broadcast %7 : vector<8x1xf32> to vector<8x128xf32>
    %9 = arith.subf %1, %8 : vector<8x128xf32>
    %10 = arith.mulf %9, %9 : vector<8x128xf32>
    %cst_7 = arith.constant dense<0.000000e+00> : vector<8xf32>
    %11 = vector.multi_reduction <add>, %10, %cst_7 [1] : vector<8x128xf32> to vector<8xf32>
    %12 = vector.shape_cast %11 : vector<8xf32> to vector<8x1xf32>
    %cst_8 = arith.constant 1.280000e+02 : f32
    %13 = vector.broadcast %cst_8 : f32 to vector<8x1xf32>
    %14 = arith.divf %12, %13 : vector<8x1xf32>
    %cst_9 = arith.constant 9.99999974E-6 : f32
    %15 = vector.broadcast %cst_9 : f32 to vector<8x1xf32>
    %16 = arith.addf %14, %15 : vector<8x1xf32>
    %17 = math.rsqrt %16 : vector<8x1xf32>
    %18 = vector.broadcast %17 : vector<8x1xf32> to vector<8x128xf32>
    %19 = arith.mulf %9, %18 : vector<8x128xf32>
    %20 = vector.broadcast %2 : vector<1x128xf32> to vector<8x128xf32>
    %21 = arith.mulf %19, %20 : vector<8x128xf32>
    %22 = vector.broadcast %3 : vector<1x128xf32> to vector<8x128xf32>
    %23 = arith.addf %21, %22 : vector<8x128xf32>
    %24 = arith.truncf %23 : vector<8x128xf32> to vector<8x128xbf16>
    %c0_10 = arith.constant 0 : index
    %c0_11 = arith.constant 0 : index
    %25 = vector.load %arg4[%c0_10, %c0_11] : memref<128x384xbf16, #tpu.memory_space<vmem>>, vector<128x384xbf16>
    %cst_12 = arith.constant dense<0.000000e+00> : vector<8x384xf32>
    %26 = tpu.matmul %24, %25, %cst_12 {dimension_numbers = #tpu.dot_dimension_numbers<[1], [0], [0], [1], [0, 0, 1, 1], [], []>} : vector<8x128xbf16>, vector<128x384xbf16>, vector<8x384xf32> -> vector<8x384xf32>
    %27 = vector.extract_strided_slice %26 {offsets = [0, 0], sizes = [8, 32], strides = [1, 1]} : vector<8x384xf32> to vector<8x32xf32>
    %28 = vector.extract_strided_slice %26 {offsets = [0, 128], sizes = [8, 32], strides = [1, 1]} : vector<8x384xf32> to vector<8x32xf32>
    %29 = vector.extract_strided_slice %26 {offsets = [0, 256], sizes = [8, 32], strides = [1, 1]} : vector<8x384xf32> to vector<8x32xf32>
    %cst_13 = arith.constant dense<0.000000e+00> : vector<8x8xf32>
    %30 = tpu.matmul %27, %28, %cst_13 {dimension_numbers = #tpu.dot_dimension_numbers<[1], [1], [0], [0], [0, 0, 1, 0], [], []>} : vector<8x32xf32>, vector<8x32xf32>, vector<8x8xf32> -> vector<8x8xf32>
    %cst_14 = arith.constant 0.176776692 : f32
    %31 = vector.broadcast %cst_14 : f32 to vector<8x8xf32>
    %32 = arith.mulf %30, %31 : vector<8x8xf32>
    %cst_15 = arith.constant dense<0xFF800000> : vector<8xf32>
    %33 = vector.multi_reduction <maximumf>, %32, %cst_15 [1] : vector<8x8xf32> to vector<8xf32>
    %34 = vector.shape_cast %33 : vector<8xf32> to vector<8x1xf32>
    %35 = vector.broadcast %34 : vector<8x1xf32> to vector<8x8xf32>
    %36 = arith.subf %32, %35 : vector<8x8xf32>
    %37 = math.exp %36 : vector<8x8xf32>
    %cst_16 = arith.constant dense<0.000000e+00> : vector<8xf32>
    %38 = vector.multi_reduction <add>, %37, %cst_16 [1] : vector<8x8xf32> to vector<8xf32>
    %39 = vector.shape_cast %38 : vector<8xf32> to vector<8x1xf32>
    %40 = tpu.reciprocal %39 {approx = true} : vector<8x1xf32> -> vector<8x1xf32>
    %41 = vector.broadcast %40 : vector<8x1xf32> to vector<8x8xf32>
    %42 = arith.mulf %37, %41 : vector<8x8xf32>
    %cst_17 = arith.constant dense<0.000000e+00> : vector<8x32xf32>
    %43 = tpu.matmul %42, %29, %cst_17 {dimension_numbers = #tpu.dot_dimension_numbers<[1], [0], [0], [1], [0, 0, 1, 1], [], []>} : vector<8x8xf32>, vector<8x32xf32>, vector<8x32xf32> -> vector<8x32xf32>
    %44 = vector.extract_strided_slice %26 {offsets = [0, 32], sizes = [8, 32], strides = [1, 1]} : vector<8x384xf32> to vector<8x32xf32>
    %45 = vector.extract_strided_slice %26 {offsets = [0, 160], sizes = [8, 32], strides = [1, 1]} : vector<8x384xf32> to vector<8x32xf32>
    %46 = vector.extract_strided_slice %26 {offsets = [0, 288], sizes = [8, 32], strides = [1, 1]} : vector<8x384xf32> to vector<8x32xf32>
    %cst_18 = arith.constant dense<0.000000e+00> : vector<8x8xf32>
    %47 = tpu.matmul %44, %45, %cst_18 {dimension_numbers = #tpu.dot_dimension_numbers<[1], [1], [0], [0], [0, 0, 1, 0], [], []>} : vector<8x32xf32>, vector<8x32xf32>, vector<8x8xf32> -> vector<8x8xf32>
    %cst_19 = arith.constant 0.176776692 : f32
    %48 = vector.broadcast %cst_19 : f32 to vector<8x8xf32>
    %49 = arith.mulf %47, %48 : vector<8x8xf32>
    %cst_20 = arith.constant dense<0xFF800000> : vector<8xf32>
    %50 = vector.multi_reduction <maximumf>, %49, %cst_20 [1] : vector<8x8xf32> to vector<8xf32>
    %51 = vector.shape_cast %50 : vector<8xf32> to vector<8x1xf32>
    %52 = vector.broadcast %51 : vector<8x1xf32> to vector<8x8xf32>
    %53 = arith.subf %49, %52 : vector<8x8xf32>
    %54 = math.exp %53 : vector<8x8xf32>
    %cst_21 = arith.constant dense<0.000000e+00> : vector<8xf32>
    %55 = vector.multi_reduction <add>, %54, %cst_21 [1] : vector<8x8xf32> to vector<8xf32>
    %56 = vector.shape_cast %55 : vector<8xf32> to vector<8x1xf32>
    %57 = tpu.reciprocal %56 {approx = true} : vector<8x1xf32> -> vector<8x1xf32>
    %58 = vector.broadcast %57 : vector<8x1xf32> to vector<8x8xf32>
    %59 = arith.mulf %54, %58 : vector<8x8xf32>
    %cst_22 = arith.constant dense<0.000000e+00> : vector<8x32xf32>
    %60 = tpu.matmul %59, %46, %cst_22 {dimension_numbers = #tpu.dot_dimension_numbers<[1], [0], [0], [1], [0, 0, 1, 1], [], []>} : vector<8x8xf32>, vector<8x32xf32>, vector<8x32xf32> -> vector<8x32xf32>
    %61 = vector.extract_strided_slice %26 {offsets = [0, 64], sizes = [8, 32], strides = [1, 1]} : vector<8x384xf32> to vector<8x32xf32>
    %62 = vector.extract_strided_slice %26 {offsets = [0, 192], sizes = [8, 32], strides = [1, 1]} : vector<8x384xf32> to vector<8x32xf32>
    %63 = vector.extract_strided_slice %26 {offsets = [0, 320], sizes = [8, 32], strides = [1, 1]} : vector<8x384xf32> to vector<8x32xf32>
    %cst_23 = arith.constant dense<0.000000e+00> : vector<8x8xf32>
    %64 = tpu.matmul %61, %62, %cst_23 {dimension_numbers = #tpu.dot_dimension_numbers<[1], [1], [0], [0], [0, 0, 1, 0], [], []>} : vector<8x32xf32>, vector<8x32xf32>, vector<8x8xf32> -> vector<8x8xf32>
    %cst_24 = arith.constant 0.176776692 : f32
    %65 = vector.broadcast %cst_24 : f32 to vector<8x8xf32>
    %66 = arith.mulf %64, %65 : vector<8x8xf32>
    %cst_25 = arith.constant dense<0xFF800000> : vector<8xf32>
    %67 = vector.multi_reduction <maximumf>, %66, %cst_25 [1] : vector<8x8xf32> to vector<8xf32>
    %68 = vector.shape_cast %67 : vector<8xf32> to vector<8x1xf32>
    %69 = vector.broadcast %68 : vector<8x1xf32> to vector<8x8xf32>
    %70 = arith.subf %66, %69 : vector<8x8xf32>
    %71 = math.exp %70 : vector<8x8xf32>
    %cst_26 = arith.constant dense<0.000000e+00> : vector<8xf32>
    %72 = vector.multi_reduction <add>, %71, %cst_26 [1] : vector<8x8xf32> to vector<8xf32>
    %73 = vector.shape_cast %72 : vector<8xf32> to vector<8x1xf32>
    %74 = tpu.reciprocal %73 {approx = true} : vector<8x1xf32> -> vector<8x1xf32>
    %75 = vector.broadcast %74 : vector<8x1xf32> to vector<8x8xf32>
    %76 = arith.mulf %71, %75 : vector<8x8xf32>
    %cst_27 = arith.constant dense<0.000000e+00> : vector<8x32xf32>
    %77 = tpu.matmul %76, %63, %cst_27 {dimension_numbers = #tpu.dot_dimension_numbers<[1], [0], [0], [1], [0, 0, 1, 1], [], []>} : vector<8x8xf32>, vector<8x32xf32>, vector<8x32xf32> -> vector<8x32xf32>
    %78 = vector.extract_strided_slice %26 {offsets = [0, 96], sizes = [8, 32], strides = [1, 1]} : vector<8x384xf32> to vector<8x32xf32>
    %79 = vector.extract_strided_slice %26 {offsets = [0, 224], sizes = [8, 32], strides = [1, 1]} : vector<8x384xf32> to vector<8x32xf32>
    %80 = vector.extract_strided_slice %26 {offsets = [0, 352], sizes = [8, 32], strides = [1, 1]} : vector<8x384xf32> to vector<8x32xf32>
    %cst_28 = arith.constant dense<0.000000e+00> : vector<8x8xf32>
    %81 = tpu.matmul %78, %79, %cst_28 {dimension_numbers = #tpu.dot_dimension_numbers<[1], [1], [0], [0], [0, 0, 1, 0], [], []>} : vector<8x32xf32>, vector<8x32xf32>, vector<8x8xf32> -> vector<8x8xf32>
    %cst_29 = arith.constant 0.176776692 : f32
    %82 = vector.broadcast %cst_29 : f32 to vector<8x8xf32>
    %83 = arith.mulf %81, %82 : vector<8x8xf32>
    %cst_30 = arith.constant dense<0xFF800000> : vector<8xf32>
    %84 = vector.multi_reduction <maximumf>, %83, %cst_30 [1] : vector<8x8xf32> to vector<8xf32>
    %85 = vector.shape_cast %84 : vector<8xf32> to vector<8x1xf32>
    %86 = vector.broadcast %85 : vector<8x1xf32> to vector<8x8xf32>
    %87 = arith.subf %83, %86 : vector<8x8xf32>
    %88 = math.exp %87 : vector<8x8xf32>
    %cst_31 = arith.constant dense<0.000000e+00> : vector<8xf32>
    %89 = vector.multi_reduction <add>, %88, %cst_31 [1] : vector<8x8xf32> to vector<8xf32>
    %90 = vector.shape_cast %89 : vector<8xf32> to vector<8x1xf32>
    %91 = tpu.reciprocal %90 {approx = true} : vector<8x1xf32> -> vector<8x1xf32>
    %92 = vector.broadcast %91 : vector<8x1xf32> to vector<8x8xf32>
    %93 = arith.mulf %88, %92 : vector<8x8xf32>
    %cst_32 = arith.constant dense<0.000000e+00> : vector<8x32xf32>
    %94 = tpu.matmul %93, %80, %cst_32 {dimension_numbers = #tpu.dot_dimension_numbers<[1], [0], [0], [1], [0, 0, 1, 1], [], []>} : vector<8x8xf32>, vector<8x32xf32>, vector<8x32xf32> -> vector<8x32xf32>
    %95 = tpu.concatenate %43, %60, %77, %94 in 1 : vector<8x32xf32>, vector<8x32xf32>, vector<8x32xf32>, vector<8x32xf32> -> vector<8x128xf32>
    %96 = arith.truncf %95 : vector<8x128xf32> to vector<8x128xbf16>
    %c0_33 = arith.constant 0 : index
    %c0_34 = arith.constant 0 : index
    %97 = vector.load %arg5[%c0_33, %c0_34] : memref<128x128xbf16, #tpu.memory_space<vmem>>, vector<128x128xbf16>
    %cst_35 = arith.constant dense<0.000000e+00> : vector<8x128xf32>
    %98 = tpu.matmul %96, %97, %cst_35 {dimension_numbers = #tpu.dot_dimension_numbers<[1], [0], [0], [1], [0, 0, 1, 1], [], []>} : vector<8x128xbf16>, vector<128x128xbf16>, vector<8x128xf32> -> vector<8x128xf32>
    %99 = arith.addf %1, %98 : vector<8x128xf32>
    %c0_36 = arith.constant 0 : index
    %c0_37 = arith.constant 0 : index
    %100 = vector.load %arg6[%c0_36, %c0_37] : memref<1x128xf32, #tpu.memory_space<vmem>>, vector<1x128xf32>
    %101 = vector.broadcast %100 : vector<1x128xf32> to vector<8x128xf32>
    %102 = arith.addf %99, %101 : vector<8x128xf32>
    %c0_38 = arith.constant 0 : index
    %c0_39 = arith.constant 0 : index
    %103 = vector.load %arg7[%c0_38, %c0_39] : memref<1x128xf32, #tpu.memory_space<vmem>>, vector<1x128xf32>
    %c0_40 = arith.constant 0 : index
    %c0_41 = arith.constant 0 : index
    %104 = vector.load %arg8[%c0_40, %c0_41] : memref<1x128xf32, #tpu.memory_space<vmem>>, vector<1x128xf32>
    %cst_42 = arith.constant dense<0.000000e+00> : vector<8xf32>
    %105 = vector.multi_reduction <add>, %102, %cst_42 [1] : vector<8x128xf32> to vector<8xf32>
    %106 = vector.shape_cast %105 : vector<8xf32> to vector<8x1xf32>
    %cst_43 = arith.constant 1.280000e+02 : f32
    %107 = vector.broadcast %cst_43 : f32 to vector<8x1xf32>
    %108 = arith.divf %106, %107 : vector<8x1xf32>
    %109 = vector.broadcast %108 : vector<8x1xf32> to vector<8x128xf32>
    %110 = arith.subf %102, %109 : vector<8x128xf32>
    %111 = arith.mulf %110, %110 : vector<8x128xf32>
    %cst_44 = arith.constant dense<0.000000e+00> : vector<8xf32>
    %112 = vector.multi_reduction <add>, %111, %cst_44 [1] : vector<8x128xf32> to vector<8xf32>
    %113 = vector.shape_cast %112 : vector<8xf32> to vector<8x1xf32>
    %cst_45 = arith.constant 1.280000e+02 : f32
    %114 = vector.broadcast %cst_45 : f32 to vector<8x1xf32>
    %115 = arith.divf %113, %114 : vector<8x1xf32>
    %cst_46 = arith.constant 9.99999974E-6 : f32
    %116 = vector.broadcast %cst_46 : f32 to vector<8x1xf32>
    %117 = arith.addf %115, %116 : vector<8x1xf32>
    %118 = math.rsqrt %117 : vector<8x1xf32>
    %119 = vector.broadcast %118 : vector<8x1xf32> to vector<8x128xf32>
    %120 = arith.mulf %110, %119 : vector<8x128xf32>
    %121 = vector.broadcast %103 : vector<1x128xf32> to vector<8x128xf32>
    %122 = arith.mulf %120, %121 : vector<8x128xf32>
    %123 = vector.broadcast %104 : vector<1x128xf32> to vector<8x128xf32>
    %124 = arith.addf %122, %123 : vector<8x128xf32>
    %125 = arith.truncf %124 : vector<8x128xf32> to vector<8x128xbf16>
    %c0_47 = arith.constant 0 : index
    %c0_48 = arith.constant 0 : index
    %126 = vector.load %arg9[%c0_47, %c0_48] : memref<128x512xbf16, #tpu.memory_space<vmem>>, vector<128x512xbf16>
    %cst_49 = arith.constant dense<0.000000e+00> : vector<8x512xf32>
    %127 = tpu.matmul %125, %126, %cst_49 {dimension_numbers = #tpu.dot_dimension_numbers<[1], [0], [0], [1], [0, 0, 1, 1], [], []>} : vector<8x128xbf16>, vector<128x512xbf16>, vector<8x512xf32> -> vector<8x512xf32>
    %c0_50 = arith.constant 0 : index
    %c0_51 = arith.constant 0 : index
    %128 = vector.load %arg10[%c0_50, %c0_51] : memref<1x512xf32, #tpu.memory_space<vmem>>, vector<1x512xf32>
    %129 = vector.broadcast %128 : vector<1x512xf32> to vector<8x512xf32>
    %130 = arith.addf %127, %129 : vector<8x512xf32>
    %cst_52 = arith.constant 5.000000e-01 : f32
    %131 = vector.broadcast %cst_52 : f32 to vector<8x512xf32>
    %132 = arith.mulf %131, %130 : vector<8x512xf32>
    %cst_53 = arith.constant 0.707106769 : f32
    %133 = vector.broadcast %cst_53 : f32 to vector<8x512xf32>
    %134 = arith.mulf %130, %133 : vector<8x512xf32>
    %135 = math.erf %134 : vector<8x512xf32>
    %cst_54 = arith.constant 1.000000e+00 : f32
    %136 = vector.broadcast %cst_54 : f32 to vector<8x512xf32>
    %137 = arith.addf %136, %135 : vector<8x512xf32>
    %138 = arith.mulf %132, %137 : vector<8x512xf32>
    %139 = arith.truncf %138 : vector<8x512xf32> to vector<8x512xbf16>
    %c0_55 = arith.constant 0 : index
    %c0_56 = arith.constant 0 : index
    %140 = vector.load %arg11[%c0_55, %c0_56] : memref<512x128xbf16, #tpu.memory_space<vmem>>, vector<512x128xbf16>
    %cst_57 = arith.constant dense<0.000000e+00> : vector<8x128xf32>
    %141 = tpu.matmul %139, %140, %cst_57 {dimension_numbers = #tpu.dot_dimension_numbers<[1], [0], [0], [1], [0, 0, 1, 1], [], []>} : vector<8x512xbf16>, vector<512x128xbf16>, vector<8x128xf32> -> vector<8x128xf32>
    %c0_58 = arith.constant 0 : index
    %c0_59 = arith.constant 0 : index
    %142 = vector.load %arg12[%c0_58, %c0_59] : memref<1x128xf32, #tpu.memory_space<vmem>>, vector<1x128xf32>
    %143 = vector.broadcast %142 : vector<1x128xf32> to vector<8x128xf32>
    %144 = arith.addf %141, %143 : vector<8x128xf32>
    %145 = arith.addf %102, %144 : vector<8x128xf32>
    %146 = vector.shape_cast %145 : vector<8x128xf32> to vector<1x8x128xf32>
    %c0_60 = arith.constant 0 : index
    %c0_61 = arith.constant 0 : index
    %c0_62 = arith.constant 0 : index
    %147 = vector.load %arg13[%c0_60, %c0_61, %c0_62] : memref<1x8x128xf32, #tpu.memory_space<vmem>>, vector<1x8x128xf32>
    tpu.vector_store %arg13[%c0_60, %c0_61, %c0_62], %146 {strides = array<i32>} : memref<1x8x128xf32, #tpu.memory_space<vmem>>, vector<1x8x128xf32>,
    return
  }
  func.func @transform_0(%arg0: i32) -> (i32, i32, i32) {
    %c0_i32 = arith.constant 0 : i32
    %c0_i32_0 = arith.constant 0 : i32
    %c0_i32_1 = arith.constant 0 : i32
    return %arg0, %c0_i32, %c0_i32_0 : i32, i32, i32
  }
  func.func @transform_1(%arg0: i32) -> (i32, i32) {
    %c0_i32 = arith.constant 0 : i32
    %c0_i32_0 = arith.constant 0 : i32
    %c0_i32_1 = arith.constant 0 : i32
    return %c0_i32, %c0_i32_0 : i32, i32
  }
  func.func @transform_2(%arg0: i32) -> (i32, i32) {
    %c0_i32 = arith.constant 0 : i32
    %c0_i32_0 = arith.constant 0 : i32
    %c0_i32_1 = arith.constant 0 : i32
    return %c0_i32, %c0_i32_0 : i32, i32
  }
  func.func @transform_3(%arg0: i32) -> (i32, i32) {
    %c0_i32 = arith.constant 0 : i32
    %c0_i32_0 = arith.constant 0 : i32
    %c0_i32_1 = arith.constant 0 : i32
    return %c0_i32, %c0_i32_0 : i32, i32
  }
  func.func @transform_4(%arg0: i32) -> (i32, i32) {
    %c0_i32 = arith.constant 0 : i32
    %c0_i32_0 = arith.constant 0 : i32
    %c0_i32_1 = arith.constant 0 : i32
    return %c0_i32, %c0_i32_0 : i32, i32
  }
  func.func @transform_5(%arg0: i32) -> (i32, i32) {
    %c0_i32 = arith.constant 0 : i32
    %c0_i32_0 = arith.constant 0 : i32
    %c0_i32_1 = arith.constant 0 : i32
    return %c0_i32, %c0_i32_0 : i32, i32
  }
  func.func @transform_6(%arg0: i32) -> (i32, i32) {
    %c0_i32 = arith.constant 0 : i32
    %c0_i32_0 = arith.constant 0 : i32
    %c0_i32_1 = arith.constant 0 : i32
    return %c0_i32, %c0_i32_0 : i32, i32
  }
  func.func @transform_7(%arg0: i32) -> (i32, i32) {
    %c0_i32 = arith.constant 0 : i32
    %c0_i32_0 = arith.constant 0 : i32
    %c0_i32_1 = arith.constant 0 : i32
    return %c0_i32, %c0_i32_0 : i32, i32
  }
  func.func @transform_8(%arg0: i32) -> (i32, i32) {
    %c0_i32 = arith.constant 0 : i32
    %c0_i32_0 = arith.constant 0 : i32
    %c0_i32_1 = arith.constant 0 : i32
    return %c0_i32, %c0_i32_0 : i32, i32
  }
  func.func @transform_9(%arg0: i32) -> (i32, i32) {
    %c0_i32 = arith.constant 0 : i32
    %c0_i32_0 = arith.constant 0 : i32
    %c0_i32_1 = arith.constant 0 : i32
    return %c0_i32, %c0_i32_0 : i32, i32
  }
  func.func @transform_10(%arg0: i32) -> (i32, i32) {
    %c0_i32 = arith.constant 0 : i32
    %c0_i32_0 = arith.constant 0 : i32
    %c0_i32_1 = arith.constant 0 : i32
    return %c0_i32, %c0_i32_0 : i32, i32
  }
  func.func @transform_11(%arg0: i32) -> (i32, i32) {
    %c0_i32 = arith.constant 0 : i32
    %c0_i32_0 = arith.constant 0 : i32
    %c0_i32_1 = arith.constant 0 : i32
    return %c0_i32, %c0_i32_0 : i32, i32
  }
  func.func @transform_12(%arg0: i32) -> (i32, i32, i32) {
    %c0_i32 = arith.constant 0 : i32
    %c0_i32_0 = arith.constant 0 : i32
    %c0_i32_1 = arith.constant 0 : i32
    return %arg0, %c0_i32, %c0_i32_0 : i32, i32, i32
  }
}

</mosaic_0001>

<bundles_post_ra>
// kernel: tpu_custom_call.1
= control target key start
LH: loop header
LB: loop body
LE: loop exit
PB: predicated region body
PF: predicated region fallthrough
CT: control target
= control target key end

     0   :  { %s3479_s0 = inlined_call_operand.hbm [shape: f32[2,8,128], index: 0, kind: input, shape index: {}]   ;;  %s3480_s1 = inlined_call_operand.hbm [shape: f32[1,128], index: 1, kind: input, shape index: {}]   ;;  %s3481_s2 = inlined_call_operand.vmem [shape: f32[1,128], index: 2, kind: input, shape index: {}]   ;;  %s3482_s3 = inlined_call_operand.hbm [shape: bf16[128,384], index: 3, kind: input, shape index: {}]   ;;  %s3483_s4 = inlined_call_operand.hbm [shape: bf16[128,128], index: 4, kind: input, shape index: {}]   ;;  %s3484_s5 = inlined_call_operand.vmem [shape: f32[1,128], index: 5, kind: input, shape index: {}]   ;;  %s3485_s6 = inlined_call_operand.vmem [shape: f32[1,128], index: 6, kind: input, shape index: {}]   ;;  %s3486_s7 = inlined_call_operand.hbm [shape: f32[1,128], index: 7, kind: input, shape index: {}]   ;;  %s3487_s8 = inlined_call_operand.hbm [shape: bf16[128,512], index: 8, kind: input, shape index: {}]   ;;  %s3488_s9 = inlined_call_operand.vmem [shape: f32[1,512], index: 9, kind: input, shape index: {}]   ;;  %s3489_s10 = inlined_call_operand.hbm [shape: bf16[512,128], index: 10, kind: input, shape index: {}]   ;;  %s3490_s11 = inlined_call_operand.vmem [shape: f32[1,128], index: 11, kind: input, shape index: {}]   ;;  %s3491_s12 = inlined_call_operand.hbm [shape: f32[2,8,128], index: 12, kind: output, shape index: {}]  }
   0x1   :  { %3493 = sst [smem:[#allocation20_spill]] %s3480_s1 }
   0x2   :  { %3494 = sst [smem:[#allocation21_spill]] %s3482_s3 }
   0x3   :  { %3495 = sst [smem:[#allocation22_spill]] %s3483_s4 }
   0x4   :  { %3496 = sst [smem:[#allocation23_spill]] %s3486_s7 }
   0x5   :  { %3497 = sst [smem:[#allocation24_spill]] %s3487_s8 }
   0x6   :  { %3498 = sst [smem:[#allocation25_spill]] %s3489_s10 }
   0x7   :  { %3499 = sst [smem:[#allocation26_spill]] %s3491_s12 }
   0x8   :  { %17 = vsyncpa [#allocation3], 0 }
   0x9   :  { %19 = vsyncpa [#allocation3 + $0x1], 0 }
   0xa   :  { %20 = vsyncpa [#allocation6], 0 }
   0xb   :  { %21 = vsyncpa [#allocation9], 0 }
   0xc   :  { %22 = vsyncpa [#allocation12], 0 }
   0xd   :  { %23 = vsyncpa [#allocation4], 0 }
   0xe   :  { %25 = vsyncpa [#allocation4 + $0x1], 0  ;;  %s3093_s21 = smov 0   ;;  %s3095_s22 = smov 0  }
   0xf   :  { %s3097_s23 = smov 0   ;;  %s3099_s24 = smov 0  }
  0x10 LB: > { %s3500_s1 = sld [smem:[#allocation20_spill]]  ;;  %s3117_s28 = sadd.s32 4294967295, %s3010_s24   ;;  %s3010_s24 = sphi %s3099_s24, %s3518_s24   ;;  %s3006_s23 = sphi %s3097_s23, %s3517_s23   ;;  %s3002_s22 = sphi %s3095_s22, %s3516_s22   ;;  %s2998_s21 = sphi %s3093_s21, %s3515_s21  }
  0x11   : > { %p2050_p0 = scmp.ge.s32.totalorder %s3010_s24, 1  ;;  %p52_p1 = scmp.eq.s32.totalorder %s3117_s28, 0 }
  0x12   : > { %p319_p2 = scmp.lt.s32.totalorder %s3010_s24, 3  ;;  %s3012_s30 = smov [#allocation5]  }
  0x13   : > { %s333_s13 = sshll.u32 %s3012_s30, 4  ;;  %s3502_s4 = sld [smem:[#allocation22_spill]]  ;;  %s334_s13 = int_to_ptr.vmem [resolvable:$true] %s333_s13 }
  0x14   : > { %p3122_p3 = pnand %p2050_p0, %p319_p2  ;;  %s3013_s18 = smov [#allocation8]  }
  0x15   : > { %s361_s19 = sshll.u32 %s3013_s18, 4  ;;  %s3014_s20 = smov 64   ;;  %s362_s19 = int_to_ptr.vmem [resolvable:$true] %s361_s19 }
  0x16   : > { %s331_s27 = sshll.u32 %s3500_s1, 4  ;;  %p2597_p5 = pneg %p3122_p3  ;;  %s332_s27 = int_to_ptr.hbm [resolvable:$true] %s331_s27 }
  0x17   : > { %s3015_s25 = smov 4   ;;  %s3504_s8 = sld [smem:[#allocation24_spill]] }
  0x18   : > { %p3134_p6 = pnand %p2597_p5, %p52_p1  ;;  %s3016_s15 = smov [#allocation11]  }
  0x19   : > { %s359_s16 = sshll.u32 %s3502_s4, 4  ;;  %s393_s1 = sshll.u32 %s3016_s15, 4  ;;  %s360_s16 = int_to_ptr.hbm [resolvable:$true] %s359_s16  ;;  %s394_s1 = int_to_ptr.vmem [resolvable:$true] %s393_s1 }
  0x1a   : > { %2600 = dma.hbm_to_vmem [thread:$0]  (!%p3134_p6), %s332_s27, 16, %s334_s13, [#allocation6]  }
  0x1b   : > { %2606 = dma.hbm_to_vmem [thread:$0]  (!%p3134_p6), %s360_s16, 1024, %s362_s19, [#allocation9], %s3014_s20, %s3014_s20, %s3015_s25  }
  0x1c   : > { %s3505_s3 = sld [smem:[#allocation21_spill]]  ;;  %s3017_s13 = smov 256  }
  0x1d   : > { %s391_s14 = sshll.u32 %s3504_s8, 4  ;;  %s3018_s12 = smov 16   ;;  %s392_s14 = int_to_ptr.hbm [resolvable:$true] %s391_s14 }
  0x1e   : > { %2612 = dma.hbm_to_vmem [thread:$0]  (!%p3134_p6), %s392_s14, 4096, %s394_s1, [#allocation12], %s3017_s13, %s3017_s13, %s3018_s12  }
  0x1f   : > { %s3019_s16 = smov [#allocation7]   ;;  %s3020_s26 = smov 192  }
  0x20   : > { %s347_s19 = sshll.u32 %s3019_s16, 4  ;;  %s3021_s30 = smov 12   ;;  %s348_s19 = int_to_ptr.vmem [resolvable:$true] %s347_s19 }
  0x21   : > { %s3506_s7 = sld [smem:[#allocation23_spill]]  ;;  %s3022_s1 = smov [#allocation10]  }
  0x22   : > { %s345_s27 = sshll.u32 %s3505_s3, 4  ;;  %s382_s12 = sshll.u32 %s3022_s1, 4  ;;  %s346_s27 = int_to_ptr.hbm [resolvable:$true] %s345_s27  ;;  %s383_s12 = int_to_ptr.vmem [resolvable:$true] %s382_s12 }
  0x23   : > { %2603 = dma.hbm_to_vmem [thread:$0]  (!%p3134_p6), %s346_s27, 3072, %s348_s19, [#allocation6], %s3020_s26, %s3020_s26, %s3021_s30  }
  0x24   : > { %s3507_s10 = sld [smem:[#allocation25_spill]]  ;;  %s3023_s27 = smov [#allocation13]  }
  0x25   : > { %s410_s19 = sshll.u32 %s3023_s27, 4  ;;  %s2049_s26 = sadd.s32 4294967294, %s3010_s24   ;;  %s411_s19 = int_to_ptr.vmem [resolvable:$true] %s410_s19 }
  0x26   : > { %s3170_s30 = sadd.s32 1, %s3010_s24   ;;  %s38_s4 = sadd.s32 1, %s3006_s23 }
  0x27   : > { %s380_s18 = sshll.u32 %s3506_s7, 4  ;;  %s35_s15 = ssub.s32 %s3010_s24, %s3170_s30  ;;  %s381_s18 = int_to_ptr.hbm [resolvable:$true] %s380_s18 }
  0x28   : > { %2609 = dma.hbm_to_vmem [thread:$0]  (!%p3134_p6), %s381_s18, 16, %s383_s12, [#allocation9]  }
  0x29   : > { %p36_p7 = scmp.eq.s32.totalorder %s35_s15, 0  ;;  %p45_p8 = scmp.ne.s32.totalorder %s3006_s23, %s3002_s22 }
  0x2a   : > { %s408_s16 = sshll.u32 %s3507_s10, 4  ;;  %p46_p9 = scmp.eq.s32.totalorder %s3010_s24, 0  ;;  %s409_s16 = int_to_ptr.hbm [resolvable:$true] %s408_s16 }
  0x2b   : > { %2615 = dma.hbm_to_vmem [thread:$0]  (!%p3134_p6), %s409_s16, 4096, %s411_s19, [#allocation12], %s3014_s20, %s3014_s20, %s3015_s25  }
  0x2c   : > { %p51_p10 = scmp.ne.s32.totalorder %s3002_s22, %s2998_s21  ;;  %p3183_p11 = por %p46_p9, %p45_p8 }
  0x2d   : > { %s3181_s18 = scalar_select %p36_p7, %s3006_s23, %s38_s4  }
  0x2e   : > { %p3189_p12 = por %p52_p1, %p51_p10  ;;  %p306_p13 = scmp.eq.s32.totalorder %s3117_s28, 1 }
  0x2f   : > { %p312_p0 = scmp.eq.s32.totalorder %s2049_s26, 1  ;;  %p2630_p2 = scmp.lt.s32.totalorder %s3010_s24, 2 }
  0x30   : > { %s427_s25 = sand.u32 1, %s3006_s23   ;;  %p3196_p5 = por %p306_p13, %p45_p8 }
  0x31   : > { %p3200_p6 = por %p312_p0, %p51_p10  ;;  %s2058_s14 = sshll.u32 %s427_s25, 3 }
  0x32   : > { %s2059_s13 = sshll.u32 %s3010_s24, 3  ;;  %s431_s15 = scalar_lea.vmem [#allocation2], %s2058_s14 }
  0x33   : > { %s435_s19 = scalar_lea.hbm %s3479_s0, %s2059_s13  ;;  %s439_s4 = sshll.u32 %s431_s15, 4  ;;  %s440_s4 = int_to_ptr.vmem [resolvable:$true] %s439_s4 }
  0x34   : > { %s437_s3 = sshll.u32 %s435_s19, 4  ;;  %p3210_p7 = pnand %p2630_p2, %p3183_p11  ;;  %s438_s3 = int_to_ptr.hbm [resolvable:$true] %s437_s3 }
  0x35   : > { %s428_s7 = scalar_lea.sflag [#allocation3], %s427_s25  ;;  %s2902_s8 = sshra.s32 %s438_s3, 4  ;;  %s2903_s8 = int_to_ptr.hbm [resolvable:$true] %s2902_s8 }
  0x36   : > { %s2904_s10 = scalar_lea.hbm %s2903_s8, 8  ;;  %p2906_p9 = pneg %p3210_p7 }
  0x37   : > { %p2905_p8 = scmp.ne.s32.totalorder %s2903_s8, %s2904_s10  ;;  %s2909_s16 = scalar_lea.hbm %s3479_s0, 16 }
  0x38   : > { %p2910_p11 = scmp.lt.s32.totalorder %s2903_s8, %s3479_s0  ;;  %p2911_p0 = scmp.lt.s32.totalorder %s2909_s16, %s2904_s10 }
  0x39   : > { %p2907_p10 = pnand %p2906_p9, %p2905_p8 }
  0x3a   : > { %p2912_p2 = por %p2911_p0, %p2910_p11 }
  0x3b   : > { %p2908_p13 = pneg %p2907_p10 }
  0x3d   : > { %p2913_p4 = pnand %p2912_p2, %p2908_p13 }
  0x3f   : > { %2916 = shalt.err (!%p2913_p4)
}
  0x40   : > { %2619 = dma.hbm_to_vmem [thread:$0]  (!%p3210_p7), %s438_s3, 128, %s440_s4, %s428_s7  }
  0x41   : > { %448 = sbr.rel (%p3122_p3) target bundleno = 2650 (0xa5a), region = 68  ;;  %s3227_s25 = sand.u32 (!%p3122_p3), 1, %s3002_s22  }
  0x42   : > { %s2061_s19 = sshll.u32 (!%p3122_p3), %s3227_s25, 3  ;;  %s451_s15 = scalar_lea.sflag (!%p3122_p3), [#allocation3], %s3227_s25 }
  0x43   : > { %s454_s8 = scalar_lea.vmem (!%p3122_p3), [#allocation2], %s2061_s19 }
  0x46   : > { %2977 = dma.done.wait (%p3189_p12), %s451_s15, 128  }
  0x47   : > { %2979 = vsyncadd (%p3189_p12), %s451_s15, 4294967168 }
  0x48   : > { %2981 = dma.done.wait (%p52_p1), [#allocation6], 3088  }
  0x49   : > { %2983 = vsyncadd (%p52_p1), [#allocation6], 4294964208 }
  0x4a   : > { %2985 = dma.done.wait (%p52_p1), [#allocation9], 1040  }
  0x4b   : > { %2987 = vsyncadd (%p52_p1), [#allocation9], 4294966256 }
  0x4c   : > { %2989 = dma.done.wait (%p52_p1), [#allocation12], 8192  }
  0x4d   : > { %2991 = vsyncadd (%p52_p1), [#allocation12], 4294959104  ;;  %v3249_v0 = vld [vmem:[%s454_s8] sm:$0xff]  ;;  %v3024_v1 = vmov 128.0   ;;  %v2155_v2 = vld [vmem:[#allocation7 + $0xa8] sm:$0xf] }
  0x4e   : > { %529 = vadd.xlane.f32.xlu0 %v3249_v0  ;;  %2692 = vrcp.f32 %v3024_v1  ;;  %v2495_v3 = vld [vmem:[#allocation7 + $0xb0] sm:$0xf0]  ;;  %v2494_v4 = vld [vmem:[#allocation7 + $0xac] sm:$0xf]  ;;  %v2157_v6 = vld [vmem:[#allocation7 + $0xb4] sm:$0xf0] }
  0x4f   : > { %v2156_v5 = vor.u32 %v2495_v3, %v2155_v2  ;;  %v2163_v7 = vld [vmem:[#allocation7 + $0xb0] sm:$0xf]  ;;  %v2496_v8 = vld [vmem:[#allocation7 + $0xb8] sm:$0xf0]  ;;  %v2160_v9 = vor.u32 %v2494_v4, %v2157_v6  ;;  %v2491_v23 = vld [vmem:[#allocation7 + $0x94] sm:$0xf] }
  0x50   : > { %v2164_v10 = vor.u32 %v2496_v8, %v2163_v7  ;;  %v2143_v21 = vld [vmem:[#allocation7 + $0x90] sm:$0xf]  ;;  %v2492_v22 = vld [vmem:[#allocation7 + $0x98] sm:$0xf0]  ;;  %v2145_v25 = vld [vmem:[#allocation7 + $0x9c] sm:$0xf0] }
  0x51   : > { %725 = vmatpush.bf16.msra.mxu0 %v2156_v5  ;;  %738 = vmatpush.bf16.msra.mxu1 %v2160_v9  ;;  %v2144_v24 = vor.u32 %v2492_v22, %v2143_v21  ;;  %v2151_v26 = vld [vmem:[#allocation7 + $0x98] sm:$0xf]  ;;  %v2493_v27 = vld [vmem:[#allocation7 + $0xa0] sm:$0xf0]  ;;  %v2148_v28 = vor.u32 %v2491_v23, %v2145_v25  ;;  %v2488_v32 = vld [vmem:[#allocation7 + $0x7c] sm:$0xf] }
  0x52   : > { %751 = vmatpush.bf16.msra.mxu2 %v2164_v10  ;;  %v2152_v29 = vor.u32 %v2493_v27, %v2151_v26  ;;  %v2131_v30 = vld [vmem:[#allocation7 + $0x78] sm:$0xf]  ;;  %v2489_v31 = vld [vmem:[#allocation7 + $0x80] sm:$0xf0]  ;;  %v2133_v34 = vld [vmem:[#allocation7 + $0x84] sm:$0xf0] }
  0x53   : > { %v2132_v33 = vor.u32 %v2489_v31, %v2131_v30  ;;  %v2139_v35 = vld [vmem:[#allocation7 + $0x80] sm:$0xf]  ;;  %v2490_v36 = vld [vmem:[#allocation7 + $0x88] sm:$0xf0]  ;;  %v2136_v37 = vor.u32 %v2488_v32, %v2133_v34  ;;  %v2485_v41 = vld [vmem:[#allocation7 + $0x64] sm:$0xf] }
  0x54   : > { %v2693_v11 = vpop.eup %2692  ;;  %v2140_v38 = vor.u32 %v2490_v36, %v2139_v35  ;;  %v2119_v39 = vld [vmem:[#allocation7 + $0x60] sm:$0xf]  ;;  %v2486_v40 = vld [vmem:[#allocation7 + $0x68] sm:$0xf0]  ;;  %v2121_v43 = vld [vmem:[#allocation7 + $0x6c] sm:$0xf0] }
  0x55   : > { %v532_v12 = vmul.f32 128.0, %v2693_v11  ;;  %vm536_vm0 = vweird.f32 %v2693_v11  ;;  %726 = vmatpush.bf16.msra.mxu0 %v2144_v24  ;;  %739 = vmatpush.bf16.msra.mxu1 %v2148_v28  ;;  %v2120_v42 = vor.u32 %v2486_v40, %v2119_v39  ;;  %v2127_v44 = vld [vmem:[#allocation7 + $0x68] sm:$0xf]  ;;  %v2487_v45 = vld [vmem:[#allocation7 + $0x70] sm:$0xf0]  ;;  %v2124_v46 = vor.u32 %v2485_v41, %v2121_v43  ;;  %s3025_s10 = smov 96  }
  0x56   : > { %752 = vmatpush.bf16.msra.mxu2 %v2152_v29  ;;  %v2128_v47 = vor.u32 %v2487_v45, %v2127_v44  ;;  %v2107_v48 = vld [vmem:[#allocation7 + $0x48] sm:$0xf]  ;;  %v2483_v49 = vld [vmem:[#allocation7 + $0x50] sm:$0xf0]  ;;  %v2482_v50 = vld [vmem:[#allocation7 + $0x4c] sm:$0xf] }
  0x57   : > { %v533_v13 = vsub.f32 1.0, %v532_v12  ;;  %v2108_v51 = vor.u32 %v2483_v49, %v2107_v48  ;;  %v2109_v52 = vld [vmem:[#allocation7 + $0x54] sm:$0xf0]  ;;  %v2115_v53 = vld [vmem:[#allocation7 + $0x50] sm:$0xf]  ;;  %vm764_vm4 = vcmask 261120  }
  0x58   : > { %v2484_v54 = vld [vmem:[#allocation7 + $0x58] sm:$0xf0]  ;;  %v2112_v55 = vor.u32 %v2482_v50, %v2109_v52  ;;  %v2095_v57 = vld [vmem:[#allocation7 + $0x30] sm:$0xf]  ;;  %v2479_v59 = vld [vmem:[#allocation7 + $0x34] sm:$0xf] }
  0x59   : > { %v534_v14 = vmul.f32 %v2693_v11, %v533_v13  ;;  %727 = vmatpush.bf16.msra.mxu0 %v2132_v33  ;;  %740 = vmatpush.bf16.msra.mxu1 %v2136_v37  ;;  %v2116_v56 = vor.u32 %v2484_v54, %v2115_v53  ;;  %v2480_v58 = vld [vmem:[#allocation7 + $0x38] sm:$0xf0]  ;;  %v2097_v61 = vld [vmem:[#allocation7 + $0x3c] sm:$0xf0]  ;;  %v2103_v62 = vld [vmem:[#allocation7 + $0x38] sm:$0xf] }
  0x5a   : > { %753 = vmatpush.bf16.msra.mxu2 %v2140_v38  ;;  %v2096_v60 = vor.u32 %v2480_v58, %v2095_v57  ;;  %v2481_v63 = vld [vmem:[#allocation7 + $0x40] sm:$0xf0]  ;;  %v2100_v1 = vor.u32 %v2479_v59, %v2097_v61  ;;  %v2083_v3 = vld [vmem:[#allocation7 + $0x18] sm:$0xf]  ;;  %v2476_v5 = vld [vmem:[#allocation7 + $0x1c] sm:$0xf] }
  0x5b   : > { %v535_v15 = vadd.f32 %v2693_v11, %v534_v14  ;;  %v2104_v2 = vor.u32 %v2481_v63, %v2103_v62  ;;  %v2477_v4 = vld [vmem:[#allocation7 + $0x20] sm:$0xf0]  ;;  %v2085_v7 = vld [vmem:[#allocation7 + $0x24] sm:$0xf0]  ;;  %v2091_v8 = vld [vmem:[#allocation7 + $0x20] sm:$0xf] }
  0x5c   : > { %v2084_v6 = vor.u32 %v2477_v4, %v2083_v3  ;;  %v2478_v9 = vld [vmem:[#allocation7 + $0x28] sm:$0xf0]  ;;  %v2088_v10 = vor.u32 %v2476_v5, %v2085_v7  ;;  %v2071_v12 = vld [vmem:[#allocation7] sm:$0xf]  ;;  %v2473_v14 = vld [vmem:[#allocation7 + $0x4] sm:$0xf] }
  0x5d   : > { %v3252_v16 = vsel %vm536_vm0, %v2693_v11, %v535_v15  ;;  %728 = vmatpush.bf16.msra.mxu0 %v2120_v42  ;;  %741 = vmatpush.bf16.msra.mxu1 %v2124_v46  ;;  %v2092_v11 = vor.u32 %v2478_v9, %v2091_v8  ;;  %v2474_v13 = vld [vmem:[#allocation7 + $0x8] sm:$0xf0]  ;;  %v2686_v32 = vld [vmem:[#allocation5] ss:$0 sm:$0xff]  ;;  %s3026_s29 = smov 32   ;;  %vm792_vm5 = vcmask 64512  }
  0x5e   : > { %754 = vmatpush.bf16.msra.mxu2 %v2128_v47  ;;  %v2072_v15 = vor.u32 %v2474_v13, %v2071_v12  ;;  %v2687_v35 = vld [vmem:[%s3481_s2] ss:$0 sm:$0xff]  ;;  %s3027_s20 = smov 64   ;;  %vm1039_vm6 = vcmask 523264   ;;  %vm1041_vm7 = vcmask 785408   ;;  %s2470_s8 = sshll.u32 %s3117_s28, 3 }
  0x5f   : > { %s1907_s28 = scalar_lea.sflag [#allocation4], %s3227_s25 }
  0x61   : > { %729 = vmatpush.bf16.msra.mxu0 %v2108_v51  ;;  %742 = vmatpush.bf16.msra.mxu1 %v2112_v55 }
  0x62   : > { %755 = vmatpush.bf16.msra.mxu2 %v2116_v56 }
  0x65   : > { %730 = vmatpush.bf16.msra.mxu0 %v2096_v60  ;;  %743 = vmatpush.bf16.msra.mxu1 %v2100_v1 }
  0x66   : > { %756 = vmatpush.bf16.msra.mxu2 %v2104_v2 }
  0x69   : > { %731 = vmatpush.bf16.msra.mxu0 %v2084_v6  ;;  %744 = vmatpush.bf16.msra.mxu1 %v2088_v10 }
  0x6a   : > { %757 = vmatpush.bf16.msra.mxu2 %v2092_v11 }
  0x6d   : > { %732 = vmatpush.bf16.msra.mxu0 %v2072_v15 }
  0xc1   : > { %v530_v17 = vpop.xlane.xlu0 %529 }
  0xc2   : > { %v538_v18 = vmul.f32 %v3252_v16, %v530_v17  ;;  %v2073_v17 = vld [vmem:[#allocation7 + $0xc] sm:$0xf0] }
  0xc3   : > { %v2076_v21 = vor.u32 %v2473_v14, %v2073_v17 }
  0xc4   : > { %v3256_v19 = vsub.f32 %v3249_v0, %v538_v18  ;;  %v2079_v18 = vld [vmem:[#allocation7 + $0x8] sm:$0xf] }
  0xc5   : > { %745 = vmatpush.bf16.msra.mxu1 %v2076_v21 }
  0xc6   : > { %v540_v20 = vmul.f32 %v3256_v19, %v3256_v19 }
  0xc8   : > { %541 = vadd.xlane.f32.xlu0 %v540_v20  ;;  %v2475_v20 = vld [vmem:[#allocation7 + $0x10] sm:$0xf0] }
  0xc9   : > { %v2080_v22 = vor.u32 %v2475_v20, %v2079_v18 }
  0xcb   : > { %758 = vmatpush.bf16.msra.mxu2 %v2080_v22 }
 0x13b   : > { %v542_v23 = vpop.xlane.xlu0 %541 }
 0x13c   : > { %v543_v24 = vmul.f32 %v542_v23, %v3252_v16 }
 0x13e   : > { %v544_v25 = vadd.f32 1e-05, %v543_v24 }
 0x140   : > { %2694 = vrsqrt.f32 %v544_v25  ;;  %vm551_vm2 = vweird.f32 %v544_v25 }
 0x146   : > { %v2695_v26 = vpop.eup %2694 }
 0x147   : > { %v546_v27 = vmul.f32 %v2695_v26, %v544_v25  ;;  %vm552_vm1 = vweird.f32 %v2695_v26 }
 0x148   : > { %vm553_vm3 = vmor %vm551_vm2, %vm552_vm1 }
 0x149   : > { %v547_v28 = vmul.f32 %v2695_v26, %v546_v27 }
 0x14b   : > { %v548_v29 = vmul.f32 0.5, %v547_v28 }
 0x14d   : > { %v549_v30 = vsub.f32 1.5, %v548_v29 }
 0x14f   : > { %v550_v31 = vmul.f32 %v2695_v26, %v549_v30 }
 0x151   : > { %v554_v33 = vsel %vm553_vm3, %v2695_v26, %v550_v31 }
 0x152   : > { %v555_v34 = vmul.f32 %v554_v33, %v3256_v19 }
 0x154   : > { %v559_v36 = vmul.f32 %v2686_v32, %v555_v34 }
 0x156   : > { %v563_v37 = vadd.f32 %v2687_v35, %v559_v36 }
 0x158   : > { %v564_v38 = vpack.c.bf16 %v563_v37, %v563_v37 }
 0x15a   : > { %733 = vmatmul.bf16.vlgmr.msra.gmra.mxu0 %v564_v38  ;;  %746 = vmatmul.bf16.vlgmr.msra.gmra.mxu1 %v564_v38 }
 0x15b   : > { %759 = vmatmul.bf16.vlgmr.msra.gmra.mxu2 %v564_v38 }
 0x1d7   : > { %v3265_v39 = vpop.f32.mrf.mxu0  ;;  %v747_v40 = vpop.f32.mrf.mxu1 }
 0x1d8   : > { %829 = vrot.lane.b32.xlu2 %v747_v40, %s3025_s10  ;;  %2165 = vmatpush.xpose.msk.msra.mxu3 %vm764_vm4, %v747_v40 }
 0x1db   : > { %2166 = vmatmul.msk.f32.vlgmr.msra.gmra.mxu3 %vm764_vm4, %v3265_v39 }
 0x1de   : > { %v3271_v19 = vpop.f32.mrf.mxu2 }
 0x1df   : > { %822 = vmatpush.msrb.mxu3 %v3271_v19  ;;  %v736_v41 = vpop.f32.mrf.mxu0  ;;  %v749_v42 = vpop.f32.mrf.mxu1 }
 0x1e0   : > { %827 = vrot.lane.b32.xlu2 %v3265_v39, %s3025_s10  ;;  %v2501_v41 = vld [vmem:[#allocation8 + $0x20] sm:$0xff]  ;;  %v2500_v42 = vld [vmem:[#allocation8 + $0x18] sm:$0xff] }
 0x1e6   : > { %v762_v43 = vpop.f32.mrf.mxu2 }
 0x1e7   : > { %v2499_v43 = vld [vmem:[#allocation8 + $0x10] sm:$0xff] }
 0x1e8   : > { %868 = vrot.lane.b32.xlu2 %v3271_v19, %s3025_s10 }
 0x1f0   : > { %962 = vrot.lane.b32.xlu2 %v747_v40, %s3026_s29 }
 0x1f8   : > { %960 = vrot.lane.b32.xlu2 %v3265_v39, %s3026_s29 }
 0x232   : > { %v830_v44 = vpop.permute.xlu2 %829 }
 0x233   : > { %2168 = vmatpush.xpose.msk.msra.mxu3 %vm764_vm4, %v830_v44  ;;  %v2498_v44 = vld [vmem:[#allocation8 + $0x8] sm:$0xff] }
 0x23a   : > { %v828_v45 = vpop.permute.xlu2 %827 }
 0x242   : > { %v869_v46 = vpop.permute.xlu2 %868 }
 0x24a   : > { %v963_v47 = vpop.permute.xlu2 %962 }
 0x24b   : > { %2174 = vmatpush.xpose.msk.msrb.mxu0 %vm764_vm4, %v963_v47 }
 0x252   : > { %v961_v48 = vpop.permute.xlu2 %960 }
 0x253   : > { %2175 = vmatmul.msk.f32.vlgmr.msrb.gmra.mxu0 %vm764_vm4, %v961_v48 }
 0x25e   : > { %v788_v49 = vpop.f32.mrf.mxu3 }
 0x25f   : > { %v791_v50 = vmul.f32 0.17677669, %v788_v49 }
 0x261   : > { %v793_v51 = vsel %vm792_vm5, %v791_v50, -inf }
 0x262   : > { %794 = vmax.xlane.f32.xlu1 %v793_v51 }
 0x2d0   : > { %v985_v1 = vpop.f32.mrf.mxu0 }
 0x2d1   : > { %v988_v2 = vmul.f32 0.17677669, %v985_v1  ;;  %v2331_v1 = vld [vmem:[#allocation11 + $0xe8] sm:$0xf] }
 0x2d3   : > { %v989_v3 = vsel %vm792_vm5, %v988_v2, -inf }
 0x2d5   : > { %v795_v52 = vpop.xlane.xlu1 %794 }
 0x2d6   : > { %v796_v53 = vsub.f32 %v791_v50, %v795_v52 }
 0x2d8   : > { %v797_v54 = vmul.f32 1.442695, %v796_v53 }
 0x2da   : > { %2696 = vpow2.f32 %v797_v54  ;;  %v2688_v54 = vld [vmem:[%s3484_s5] ss:$0 sm:$0xff] }
 0x2e0   : > { %v2697_v55 = vpop.eup %2696 }
 0x2e1   : > { %v799_v56 = vsel %vm792_vm5, %v2697_v55, 0.0 }
 0x2e2   : > { %800 = vadd.xlane.f32.xlu1 %v799_v56 }
 0x355   : > { %v801_v57 = vpop.xlane.xlu1 %800 }
 0x356   : > { %2698 = vrcp.f32 %v801_v57 }
 0x35c   : > { %v2699_v58 = vpop.eup %2698 }
 0x35d   : > { %v803_v59 = vmul.f32 %v2699_v58, %v2697_v55 }
 0x35f   : > { %2167 = vmatmul.msk.f32.vlgmr.msrb.gmra.mxu3 %vm792_vm5, %v803_v59  ;;  %v2323_v59 = vld [vmem:[#allocation11 + $0xe0] sm:$0xf] }
 0x360   : > { %889 = vmatpush.msrb.mxu3 %v869_v46  ;;  %v2497_v46 = vld [vmem:[#allocation8] sm:$0xff] }
 0x367   : > { %2169 = vmatmul.msk.f32.vlgmr.msra.gmra.mxu3 %vm764_vm4, %v828_v45 }
 0x3e2   : > { %v3288_v60 = vpop.f32.mrf.mxu3 }
 0x3ea   : > { %v852_v61 = vpop.f32.mrf.mxu3 }
 0x3eb   : > { %v855_v62 = vmul.f32 0.17677669, %v852_v61  ;;  %v2533_v61 = vld [vmem:[#allocation11 + $0xe4] sm:$0xf] }
 0x3ed   : > { %v856_v63 = vsel %vm792_vm5, %v855_v62, -inf }
 0x3ee   : > { %857 = vmax.xlane.f32.xlu0 %v856_v63  ;;  %v2325_v63 = vld [vmem:[#allocation11 + $0xf0] sm:$0xf0] }
 0x402   : > { %896 = vrot.lane.b32.xlu0 %v747_v40, %s3027_s20  ;;  %v2503_v40 = vld [vmem:[#allocation8 + $0x30] sm:$0xff] }
 0x42c   : > { %990 = vmax.xlane.f32.xlu0 %v989_v3  ;;  %v2328_v3 = vor.u32 %v2533_v61, %v2325_v63  ;;  %v2243_v61 = vld [vmem:[#allocation11 + $0x40] sm:$0xf]  ;;  %v2513_v63 = vld [vmem:[#allocation11 + $0x44] sm:$0xf] }
 0x42e   : > { %1373 = vmatpush.bf16.msra.mxu0 %v2328_v3  ;;  %v2251_v3 = vld [vmem:[#allocation11 + $0x48] sm:$0xf] }
 0x440   : > { %934 = vrot.lane.b32.xlu0 %v3271_v19, %s3027_s20 }
 0x461   : > { %v858_v4 = vpop.xlane.xlu0 %857 }
 0x462   : > { %v859_v5 = vsub.f32 %v855_v62, %v858_v4 }
 0x464   : > { %v860_v6 = vmul.f32 1.442695, %v859_v5  ;;  %v2534_v5 = vld [vmem:[#allocation11 + $0xec] sm:$0xf] }
 0x466   : > { %2700 = vpow2.f32 %v860_v6  ;;  %v2333_v6 = vld [vmem:[#allocation11 + $0xf8] sm:$0xf0] }
 0x46c   : > { %v2701_v7 = vpop.eup %2700 }
 0x46d   : > { %v862_v8 = vsel %vm792_vm5, %v2701_v7, 0.0 }
 0x46e   : > { %863 = vadd.xlane.f32.xlu1 %v862_v8 }
 0x474   : > { %v897_v9 = vpop.permute.xlu0 %896 }
 0x475   : > { %2171 = vmatpush.xpose.msk.msra.mxu3 %vm764_vm4, %v897_v9 }
 0x487   : > { %894 = vrot.lane.b32.xlu1 %v3265_v39, %s3027_s20  ;;  %v2504_v39 = vld [vmem:[#allocation8 + $0x38] sm:$0xff] }
 0x488   : > { %1108 = vmatpush.bf16.msrb.mxu2 %v2504_v39  ;;  %v2521_v39 = vld [vmem:[#allocation11 + $0x84] sm:$0xf] }
 0x48c   : > { %1109 = vmatpush.bf16.msrb.mxu2 %v2503_v40 }
 0x49f   : > { %v991_v11 = vpop.xlane.xlu0 %990 }
 0x4a0   : > { %v992_v18 = vsub.f32 %v988_v2, %v991_v11  ;;  %v2536_v2 = vld [vmem:[#allocation11 + $0xf4] sm:$0xf0]  ;;  %v2307_v11 = vld [vmem:[#allocation11 + $0xc0] sm:$0xf] }
 0x4a1   : > { %v2332_v4 = vor.u32 %v2536_v2, %v2331_v1  ;;  %v2245_v2 = vld [vmem:[#allocation11 + $0x50] sm:$0xf0] }
 0x4a2   : > { %v993_v20 = vmul.f32 1.442695, %v992_v18  ;;  %v2532_v18 = vld [vmem:[#allocation11 + $0xd4] sm:$0xf0] }
 0x4b2   : > { %v935_v14 = vpop.permute.xlu0 %934 }
 0x4e1   : > { %v864_v10 = vpop.xlane.xlu1 %863 }
 0x4e2   : > { %2702 = vrcp.f32 %v864_v10 }
 0x4e3   : > { %2704 = vpow2.f32 %v993_v20 }
 0x4e8   : > { %v2703_v12 = vpop.eup %2702 }
 0x4e9   : > { %v866_v13 = vmul.f32 %v2703_v12, %v2701_v7  ;;  %v2705_v24 = vpop.eup %2704  ;;  %v2336_v7 = vor.u32 %v2534_v5, %v2333_v6  ;;  %v2531_v12 = vld [vmem:[#allocation11 + $0xcc] sm:$0xf0]  ;;  %v2248_v5 = vor.u32 %v2513_v63, %v2245_v2 }
 0x4ea   : > { %v995_v25 = vsel %vm792_vm5, %v2705_v24, 0.0 }
 0x4eb   : > { %2170 = vmatmul.msk.f32.vlgmr.msrb.gmra.mxu3 %vm792_vm5, %v866_v13  ;;  %v2529_v13 = vld [vmem:[#allocation11 + $0xc4] sm:$0xf] }
 0x4ec   : > { %955 = vmatpush.msrb.mxu3 %v935_v14  ;;  %v2308_v14 = vor.u32 %v2531_v12, %v2307_v11  ;;  %v2511_v11 = vld [vmem:[#allocation11 + $0x2c] sm:$0xf0]  ;;  %v2509_v12 = vld [vmem:[#allocation11 + $0x24] sm:$0xf] }
 0x4f9   : > { %v895_v15 = vpop.permute.xlu1 %894 }
 0x4fa   : > { %2172 = vmatmul.msk.f32.vlgmr.msra.gmra.mxu3 %vm764_vm4, %v895_v15  ;;  %v2309_v15 = vld [vmem:[#allocation11 + $0xd0] sm:$0xf0] }
 0x4fb   : > { %v2312_v20 = vor.u32 %v2529_v13, %v2309_v15  ;;  %v2235_v15 = vld [vmem:[#allocation11 + $0x28] sm:$0xf] }
 0x4fd   : > { %1374 = vmatpush.bf16.msra.mxu0 %v2312_v20 }
 0x56e   : > { %v891_v17 = vpop.f32.mrf.mxu3 }
 0x57d   : > { %v919_v21 = vpop.f32.mrf.mxu3 }
 0x57e   : > { %v922_v22 = vmul.f32 0.17677669, %v919_v21 }
 0x580   : > { %v923_v23 = vsel %vm792_vm5, %v922_v22, -inf }
 0x581   : > { %924 = vmax.xlane.f32.xlu2 %v923_v23  ;;  %v2317_v23 = vld [vmem:[#allocation11 + $0xd8] sm:$0xf0] }
 0x589   : > { %996 = vadd.xlane.f32.xlu2 %v995_v25  ;;  %v2291_v25 = vld [vmem:[#allocation11 + $0xa0] sm:$0xf] }
 0x5a1   : > { %1000 = vrot.lane.b32.xlu2 %v3271_v19, %s3026_s29  ;;  %v2502_v19 = vld [vmem:[#allocation8 + $0x28] sm:$0xff] }
 0x5a2   : > { %1110 = vmatpush.bf16.msrb.mxu2 %v2502_v19  ;;  %v2277_v19 = vld [vmem:[#allocation11 + $0x90] sm:$0xf0] }
 0x5a6   : > { %1111 = vmatpush.bf16.msrb.mxu2 %v2501_v41  ;;  %v2283_v41 = vld [vmem:[#allocation11 + $0x88] sm:$0xf] }
 0x5aa   : > { %1112 = vmatpush.bf16.msrb.mxu2 %v2500_v42  ;;  %v2524_v42 = vld [vmem:[#allocation11 + $0x94] sm:$0xf0] }
 0x5ae   : > { %1113 = vmatpush.bf16.msrb.mxu2 %v2499_v43  ;;  %v2280_v43 = vor.u32 %v2521_v39, %v2277_v19 }
 0x5b2   : > { %1114 = vmatpush.bf16.msrb.mxu2 %v2498_v44  ;;  %v2284_v44 = vor.u32 %v2524_v42, %v2283_v41 }
 0x5b6   : > { %1115 = vmatpush.bf16.msrb.mxu2 %v2497_v46  ;;  %v2285_v46 = vld [vmem:[#allocation11 + $0x98] sm:$0xf0] }
 0x5ba   : > { %1399 = vmatpush.bf16.msra.mxu2 %v2336_v7  ;;  %v2514_v7 = vld [vmem:[#allocation11 + $0x4c] sm:$0xf] }
 0x5f4   : > { %v925_v26 = vpop.xlane.xlu2 %924 }
 0x5f5   : > { %v926_v27 = vsub.f32 %v922_v22, %v925_v26  ;;  %v2530_v22 = vld [vmem:[#allocation11 + $0xcc] sm:$0xf]  ;;  %v2527_v26 = vld [vmem:[#allocation11 + $0xac] sm:$0xf0] }
 0x5f7   : > { %v927_v28 = vmul.f32 1.442695, %v926_v27  ;;  %v2525_v27 = vld [vmem:[#allocation11 + $0xa4] sm:$0xf] }
 0x5f9   : > { %2706 = vpow2.f32 %v927_v28  ;;  %v2292_v28 = vor.u32 %v2527_v26, %v2291_v25  ;;  %v2507_v25 = vld [vmem:[#allocation11 + $0xc] sm:$0xf0]  ;;  %v2505_v26 = vld [vmem:[#allocation11 + $0x4] sm:$0xf] }
 0x5fc   : > { %v997_v29 = vpop.xlane.xlu2 %996 }
 0x5fd   : > { %2708 = vrcp.f32 %v997_v29  ;;  %v2293_v29 = vld [vmem:[#allocation11 + $0xb0] sm:$0xf0] }
 0x5ff   : > { %v2707_v30 = vpop.eup %2706 }
 0x600   : > { %v929_v31 = vsel %vm792_vm5, %v2707_v30, 0.0 }
 0x601   : > { %930 = vadd.xlane.f32.xlu1 %v929_v31  ;;  %v2528_v31 = vld [vmem:[#allocation11 + $0xb4] sm:$0xf0] }
 0x603   : > { %v2709_v32 = vpop.eup %2708 }
 0x604   : > { %v1001_v33 = vpop.permute.xlu2 %1000  ;;  %v999_v34 = vmul.f32 %v2709_v32, %v2705_v24  ;;  %v2320_v24 = vor.u32 %v2530_v22, %v2317_v23  ;;  %v2296_v32 = vor.u32 %v2525_v27, %v2293_v29  ;;  %v2237_v22 = vld [vmem:[#allocation11 + $0x38] sm:$0xf0]  ;;  %v2211_v23 = vld [vmem:[#allocation11] sm:$0xf]  ;;  %v2213_v27 = vld [vmem:[#allocation11 + $0x10] sm:$0xf0] }
 0x605   : > { %1021 = vmatpush.msrb.mxu1 %v1001_v33  ;;  %v2216_v29 = vor.u32 %v2505_v26, %v2213_v27 }
 0x606   : > { %2176 = vmatmul.msk.f32.vlgmr.msrb.gmra.mxu1 %vm792_vm5, %v999_v34  ;;  %1400 = vmatpush.bf16.msra.mxu2 %v2320_v24  ;;  %v2526_v34 = vld [vmem:[#allocation11 + $0xac] sm:$0xf] }
 0x607   : > { %1386 = vmatpush.bf16.msra.mxu1 %v2332_v4  ;;  %1375 = vmatpush.bf16.msra.mxu0 %v2296_v32  ;;  %v2516_v4 = vld [vmem:[#allocation11 + $0x54] sm:$0xf0]  ;;  %v2506_v32 = vld [vmem:[#allocation11 + $0xc] sm:$0xf] }
 0x608   : > { %v2252_v6 = vor.u32 %v2516_v4, %v2251_v3 }
 0x60b   : > { %1376 = vmatpush.bf16.msra.mxu0 %v2280_v43 }
 0x61a   : > { %1027 = vrot.lane.b32.xlu1 %v891_v17, %s3026_s29  ;;  %v2315_v17 = vld [vmem:[#allocation11 + $0xc8] sm:$0xf] }
 0x61b   : > { %v2316_v21 = vor.u32 %v2532_v18, %v2315_v17  ;;  %v2512_v17 = vld [vmem:[#allocation11 + $0x34] sm:$0xf0] }
 0x61c   : > { %v2236_v20 = vor.u32 %v2512_v17, %v2235_v15 }
 0x61d   : > { %1387 = vmatpush.bf16.msra.mxu1 %v2316_v21  ;;  %v2510_v21 = vld [vmem:[#allocation11 + $0x2c] sm:$0xf] }
 0x61e   : > { %v2240_v24 = vor.u32 %v2510_v21, %v2237_v22  ;;  %v2544_v21 = vld [vmem:[#allocation13 + $0x38] sm:$0xff] }
 0x674   : > { %v931_v35 = vpop.xlane.xlu1 %930 }
 0x675   : > { %2710 = vrcp.f32 %v931_v35  ;;  %v2301_v35 = vld [vmem:[#allocation11 + $0xb8] sm:$0xf0] }
 0x67b   : > { %v2711_v36 = vpop.eup %2710 }
 0x67c   : > { %v933_v37 = vmul.f32 %v2711_v36, %v2707_v30  ;;  %v2299_v30 = vld [vmem:[#allocation11 + $0xa8] sm:$0xf]  ;;  %v2304_v36 = vor.u32 %v2526_v34, %v2301_v35  ;;  %v2221_v34 = vld [vmem:[#allocation11 + $0x18] sm:$0xf0] }
 0x67d   : > { %v2300_v33 = vor.u32 %v2528_v31, %v2299_v30  ;;  %v2219_v30 = vld [vmem:[#allocation11 + $0x8] sm:$0xf]  ;;  %v2508_v31 = vld [vmem:[#allocation11 + $0x14] sm:$0xf0]  ;;  %v2224_v35 = vor.u32 %v2506_v32, %v2221_v34 }
 0x67e   : > { %2173 = vmatmul.msk.f32.vlgmr.msrb.gmra.mxu3 %vm792_vm5, %v933_v37  ;;  %v2275_v37 = vld [vmem:[#allocation11 + $0x80] sm:$0xf]  ;;  %1401 = vmatpush.bf16.msra.mxu2 %v2304_v36 }
 0x67f   : > { %1388 = vmatpush.bf16.msra.mxu1 %v2300_v33  ;;  %v2220_v33 = vor.u32 %v2508_v31, %v2219_v30  ;;  %v2558_v30 = vld [vmem:[#allocation13 + $0xa8] sm:$0xff] }
 0x683   : > { %v1023_v38 = vpop.f32.mrf.mxu1  ;;  %1389 = vmatpush.bf16.msra.mxu1 %v2284_v44  ;;  %v2689_v44 = vld [vmem:[%s3485_s6] ss:$0 sm:$0xff] }
 0x684   : > { %1035 = vrot.lane.b32.xlu2 %v1023_v38, %s3025_s10  ;;  %v2523_v38 = vld [vmem:[#allocation11 + $0x8c] sm:$0xf0]  ;;  %s3513_s10 = sld [smem:[#allocation26_spill]] }
 0x685   : > { %v2276_v40 = vor.u32 %v2523_v38, %v2275_v37 }
 0x68a   : > { %s1917_s29 = scalar_lea.hbm %s3513_s10, %s2470_s8 }
 0x68b   : > { %s1921_s26 = sshll.u32 %s1917_s29, 4  ;;  %s1922_s26 = int_to_ptr.hbm [resolvable:$true] %s1921_s26 }
 0x68c   : > { %v1028_v47 = vpop.permute.xlu1 %1027  ;;  %s2946_s14 = sshra.s32 %s1922_s26, 4  ;;  %s2947_s14 = int_to_ptr.hbm [resolvable:$true] %s2946_s14 }
 0x68d   : > { %v1038_v48 = vsel %vm764_vm4, %v3288_v60, %v1028_v47  ;;  %v2535_v60 = vld [vmem:[#allocation11 + $0xec] sm:$0xf0]  ;;  %s2948_s13 = scalar_lea.hbm %s2947_s14, 8  ;;  %p2953_p12 = scmp.lt.s32.totalorder %s2947_s14, %s3513_s10 }
 0x68e   : > { %v2324_v62 = vor.u32 %v2535_v60, %v2323_v59  ;;  %v2269_v59 = vld [vmem:[#allocation11 + $0x78] sm:$0xf0]  ;;  %p2949_p1 = scmp.ne.s32.totalorder %s2947_s14, %s2948_s13 }
 0x690   : > { %1360 = vmatpush.bf16.msra.mxu3 %v2324_v62  ;;  %v2515_v62 = vld [vmem:[#allocation11 + $0x4c] sm:$0xf0]  ;;  %p2950_p3 = pnand %p2949_p1, %p3196_p5 }
 0x691   : > { %v2244_v1 = vor.u32 %v2515_v62, %v2243_v61  ;;  %v2552_v61 = vld [vmem:[#allocation13 + $0x78] sm:$0xff] }
 0x692   : > { %v2560_v62 = vld [vmem:[#allocation13 + $0xb8] sm:$0xff]  ;;  %p2951_p4 = pneg %p2950_p3 }
 0x694   : > { %1361 = vmatpush.bf16.msra.mxu3 %v2308_v14  ;;  %v2229_v14 = vld [vmem:[#allocation11 + $0x30] sm:$0xf0] }
 0x695   : > { %v2232_v18 = vor.u32 %v2509_v12, %v2229_v14 }
 0x698   : > { %1362 = vmatpush.bf16.msra.mxu3 %v2292_v28  ;;  %v2212_v28 = vor.u32 %v2507_v25, %v2211_v23 }
 0x69c   : > { %1363 = vmatpush.bf16.msra.mxu3 %v2276_v40 }
 0x6de   : > { %v1036_v50 = vpop.permute.xlu2 %1035 }
 0x701   : > { %v957_v45 = vpop.f32.mrf.mxu3 }
 0x702   : > { %1031 = vrot.lane.b32.xlu0 %v957_v45, %s3027_s20  ;;  %v2522_v45 = vld [vmem:[#allocation11 + $0x8c] sm:$0xf]  ;;  %s525_s20 = scalar_lea.vmem [#allocation14], %s2061_s19  ;;  %s2952_s19 = scalar_lea.hbm %s3513_s10, 16 }
 0x703   : > { %v2288_v47 = vor.u32 %v2522_v45, %v2285_v46  ;;  %s1919_s4 = sshll.u32 %s525_s20, 4  ;;  %p2954_p7 = scmp.lt.s32.totalorder %s2952_s19, %s2948_s13  ;;  %s1920_s4 = int_to_ptr.vmem [resolvable:$true] %s1919_s4 }
 0x705   : > { %1402 = vmatpush.bf16.msra.mxu2 %v2288_v47  ;;  %v2690_v47 = vld [vmem:[#allocation10] ss:$0 sm:$0xff]  ;;  %p2955_p8 = por %p2954_p7, %p2953_p12 }
 0x707   : > { %p2956_p9 = pnand %p2955_p8, %p2951_p4 }
 0x774   : > { %v1032_v49 = vpop.permute.xlu0 %1031 }
 0x775   : > { %v1040_v51 = vsel %vm1039_vm6, %v1038_v48, %v1032_v49  ;;  %v2259_v48 = vld [vmem:[#allocation11 + $0x60] sm:$0xf]  ;;  %v2519_v49 = vld [vmem:[#allocation11 + $0x6c] sm:$0xf0] }
 0x776   : > { %v1042_v52 = vsel %vm1041_vm7, %v1040_v51, %v1036_v50  ;;  %v2517_v50 = vld [vmem:[#allocation11 + $0x64] sm:$0xf]  ;;  %v2260_v51 = vor.u32 %v2519_v49, %v2259_v48 }
 0x777   : > { %v1043_v53 = vpack.c.bf16 %v1042_v52, %v1042_v52  ;;  %v2261_v52 = vld [vmem:[#allocation11 + $0x70] sm:$0xf0] }
 0x778   : > { %1364 = vmatpush.bf16.msra.mxu3 %v2260_v51 }
 0x779   : > { %1116 = vmatmul.bf16.vlgmr.msrb.gmra.mxu2 %v1043_v53  ;;  %v2267_v53 = vld [vmem:[#allocation11 + $0x68] sm:$0xf] }
 0x77c   : > { %1365 = vmatpush.bf16.msra.mxu3 %v2244_v1 }
 0x7fc   : > { %v1117_v55 = vpop.f32.mrf.mxu2 }
 0x7fd   : > { %v1121_v56 = vadd.f32 %v1117_v55, %v3249_v0  ;;  %v2264_v55 = vor.u32 %v2517_v50, %v2261_v52  ;;  %v1190_v50 = vld [vmem:[%s3488_s9] sm:$0xf] }
 0x7fe   : > { %v1193_v51 = vperm.slane %v1190_v50, 1  ;;  %v1194_v52 = vperm.slane %v1190_v50, 2 }
 0x7ff   : > { %v3317_v57 = vadd.f32 %v2688_v54, %v1121_v56  ;;  %v2520_v54 = vld [vmem:[#allocation11 + $0x74] sm:$0xf0]  ;;  %1377 = vmatpush.bf16.msra.mxu0 %v2264_v55 }
 0x800   : > { %v2268_v56 = vor.u32 %v2520_v54, %v2267_v53 }
 0x801   : > { %1129 = vadd.xlane.f32.xlu0 %v3317_v57 }
 0x802   : > { %1390 = vmatpush.bf16.msra.mxu1 %v2268_v56 }
 0x803   : > { %1378 = vmatpush.bf16.msra.mxu0 %v2248_v5 }
 0x804   : > { %v1119_v58 = vpop.f32.mrf.mxu2 }
 0x805   : > { %v2518_v58 = vld [vmem:[#allocation11 + $0x6c] sm:$0xf] }
 0x806   : > { %v2272_v60 = vor.u32 %v2518_v58, %v2269_v59  ;;  %1391 = vmatpush.bf16.msra.mxu1 %v2252_v6  ;;  %v1192_v58 = vperm.slane %v1190_v50, 0 }
 0x807   : > { %1379 = vmatpush.bf16.msra.mxu0 %v2232_v18 }
 0x808   : > { %1403 = vmatpush.bf16.msra.mxu2 %v2272_v60  ;;  %v1195_v60 = vperm.slane %v1190_v50, 3 }
 0x80a   : > { %1392 = vmatpush.bf16.msra.mxu1 %v2236_v20 }
 0x80b   : > { %1380 = vmatpush.bf16.msra.mxu0 %v2216_v29  ;;  %v2550_v29 = vld [vmem:[#allocation13 + $0x68] sm:$0xff] }
 0x80e   : > { %1393 = vmatpush.bf16.msra.mxu1 %v2220_v33 }
 0x80f   : > { %1865 = vmatpush.bf16.msrb.mxu0 %v2552_v61 }
 0x812   : > { %1878 = vmatpush.bf16.msrb.mxu1 %v2560_v62 }
 0x874   : > { %v1130_v0 = vpop.xlane.xlu0 %1129 }
 0x875   : > { %v1131_v8 = vmul.f32 %v1130_v0, %v3252_v16  ;;  %v2253_v0 = vld [vmem:[#allocation11 + $0x58] sm:$0xf0] }
 0x877   : > { %v3322_v9 = vsub.f32 %v3317_v57, %v1131_v8  ;;  %v2256_v8 = vor.u32 %v2514_v7, %v2253_v0 }
 0x879   : > { %v1133_v10 = vmul.f32 %v3322_v9, %v3322_v9  ;;  %1404 = vmatpush.bf16.msra.mxu2 %v2256_v8  ;;  %v2551_v8 = vld [vmem:[#allocation13 + $0x70] sm:$0xff] }
 0x87a   : > { %1866 = vmatpush.bf16.msrb.mxu0 %v2551_v8  ;;  %v2556_v8 = vld [vmem:[#allocation13 + $0x98] sm:$0xff] }
 0x87b   : > { %1134 = vadd.xlane.f32.xlu1 %v1133_v10  ;;  %v2227_v10 = vld [vmem:[#allocation11 + $0x20] sm:$0xf] }
 0x87c   : > { %v2228_v13 = vor.u32 %v2511_v11, %v2227_v10  ;;  %v2559_v10 = vld [vmem:[#allocation13 + $0xb0] sm:$0xff] }
 0x87d   : > { %1405 = vmatpush.bf16.msra.mxu2 %v2240_v24  ;;  %1879 = vmatpush.bf16.msrb.mxu1 %v2559_v10 }
 0x87e   : > { %1366 = vmatpush.bf16.msra.mxu3 %v2228_v13  ;;  %1867 = vmatpush.bf16.msrb.mxu0 %v2550_v29 }
 0x881   : > { %1406 = vmatpush.bf16.msra.mxu2 %v2224_v35  ;;  %1880 = vmatpush.bf16.msrb.mxu1 %v2558_v30 }
 0x882   : > { %1367 = vmatpush.bf16.msra.mxu3 %v2212_v28  ;;  %v2568_v28 = vld [vmem:[#allocation13 + $0xf8] sm:$0xff] }
 0x885   : > { %1891 = vmatpush.bf16.msrb.mxu2 %v2568_v28 }
 0x886   : > { %1852 = vmatpush.bf16.msrb.mxu3 %v2544_v21 }
 0x8ee   : > { %v1135_v36 = vpop.xlane.xlu1 %1134 }
 0x8ef   : > { %v1136_v37 = vmul.f32 %v1135_v36, %v3252_v16  ;;  %v2543_v36 = vld [vmem:[#allocation13 + $0x30] sm:$0xff] }
 0x8f0   : > { %1853 = vmatpush.bf16.msrb.mxu3 %v2543_v36 }
 0x8f1   : > { %v1137_v38 = vadd.f32 1e-05, %v1136_v37 }
 0x8f3   : > { %2712 = vrsqrt.f32 %v1137_v38  ;;  %vm1144_vm9 = vweird.f32 %v1137_v38 }
 0x8f9   : > { %v2713_v39 = vpop.eup %2712 }
 0x8fa   : > { %v1139_v40 = vmul.f32 %v2713_v39, %v1137_v38  ;;  %vm1145_vm8 = vweird.f32 %v2713_v39 }
 0x8fb   : > { %vm1146_vm10 = vmor %vm1144_vm9, %vm1145_vm8 }
 0x8fc   : > { %v1140_v19 = vmul.f32 %v2713_v39, %v1139_v40  ;;  %v2567_v40 = vld [vmem:[#allocation13 + $0xf0] sm:$0xff] }
 0x8fd   : > { %1892 = vmatpush.bf16.msrb.mxu2 %v2567_v40 }
 0x8fe   : > { %v1141_v41 = vmul.f32 0.5, %v1140_v19 }
 0x900   : > { %v1142_v42 = vsub.f32 1.5, %v1141_v41 }
 0x902   : > { %v1143_v43 = vmul.f32 %v2713_v39, %v1142_v42 }
 0x904   : > { %v1147_v45 = vsel %vm1146_vm10, %v2713_v39, %v1143_v43 }
 0x905   : > { %v1148_v46 = vmul.f32 %v1147_v45, %v3322_v9 }
 0x907   : > { %v1152_v16 = vmul.f32 %v2689_v44, %v1148_v46 }
 0x909   : > { %v1156_v48 = vadd.f32 %v2690_v47, %v1152_v16  ;;  %v2549_v47 = vld [vmem:[#allocation13 + $0x60] sm:$0xff] }
 0x90a   : > { %v2557_v16 = vld [vmem:[#allocation13 + $0xa0] sm:$0xff]  ;;  %1868 = vmatpush.bf16.msrb.mxu0 %v2549_v47 }
 0x90b   : > { %v1157_v49 = vpack.c.bf16 %v1156_v48, %v1156_v48  ;;  %1881 = vmatpush.bf16.msrb.mxu1 %v2557_v16  ;;  %v2545_v16 = vld [vmem:[#allocation13 + $0x40] sm:$0xff] }
 0x90d   : > { %1368 = vmatmul.bf16.vlgmr.msra.gmra.mxu3 %v1157_v49  ;;  %1381 = vmatmul.bf16.vlgmr.msra.gmra.mxu0 %v1157_v49 }
 0x90e   : > { %1394 = vmatmul.bf16.vlgmr.msra.gmra.mxu1 %v1157_v49  ;;  %1407 = vmatmul.bf16.vlgmr.msra.gmra.mxu2 %v1157_v49 }
 0x90f   : > { %1882 = vmatpush.bf16.msrb.mxu1 %v2556_v8 }
 0x98a   : > { %v1382_v53 = vpop.f32.mrf.mxu0 }
 0x98b   : > { %v3334_v54 = vadd.f32 %v1382_v53, %v1193_v51  ;;  %v1395_v55 = vpop.f32.mrf.mxu1  ;;  %v2542_v51 = vld [vmem:[#allocation13 + $0x28] sm:$0xff] }
 0x98c   : > { %v3336_v56 = vadd.f32 %v1395_v55, %v1194_v52  ;;  %v2566_v52 = vld [vmem:[#allocation13 + $0xe8] sm:$0xff]  ;;  %1854 = vmatpush.bf16.msrb.mxu3 %v2542_v51  ;;  %v2553_v51 = vld [vmem:[#allocation13 + $0x80] sm:$0xff] }
 0x98d   : > { %v3339_v9 = vmul.f32 0.70710677, %v3334_v54  ;;  %1893 = vmatpush.bf16.msrb.mxu2 %v2566_v52 }
 0x98e   : > { %v3342_v59 = vmul.f32 0.70710677, %v3336_v56 }
 0x98f   : > { %v1460_v63 = vmul.f32 %v3339_v9, %v3339_v9 }
 0x990   : > { %v1500_v1 = vmul.f32 %v3342_v59, %v3342_v59  ;;  %v1369_v2 = vpop.f32.mrf.mxu3 }
 0x991   : > { %v3348_v3 = vmin.f32 %v1460_v63, 16.0  ;;  %v3350_v4 = vadd.f32 %v1369_v2, %v1192_v58  ;;  %v1408_v5 = vpop.f32.mrf.mxu2 }
 0x992   : > { %v3352_v6 = vmin.f32 %v1500_v1, 16.0  ;;  %v3354_v7 = vadd.f32 %v1408_v5, %v1195_v60  ;;  %v1384_v0 = vpop.f32.mrf.mxu0 }
 0x993   : > { %v1462_v11 = vmul.f32 2.1237322e-06, %v3348_v3  ;;  %v1473_v12 = vmul.f32 3.8918573e-05, %v3348_v3  ;;  %v1397_v13 = vpop.f32.mrf.mxu1  ;;  %v3361_v17 = vmul.f32 0.70710677, %v3350_v4 }
 0x994   : > { %v1502_v14 = vmul.f32 2.1237322e-06, %v3352_v6  ;;  %v1513_v15 = vmul.f32 3.8918573e-05, %v3352_v6  ;;  %v3366_v25 = vmul.f32 0.70710677, %v3354_v7 }
 0x995   : > { %v1463_v18 = vadd.f32 0.00028619796, %v1462_v11  ;;  %v1474_v20 = vadd.f32 0.001143296, %v1473_v12  ;;  %v1420_v24 = vmul.f32 %v3361_v17, %v3361_v17  ;;  %v2548_v0 = vld [vmem:[#allocation13 + $0x58] sm:$0xff]  ;;  %v2541_v12 = vld [vmem:[#allocation13 + $0x20] sm:$0xff] }
 0x996   : > { %v1503_v22 = vadd.f32 0.00028619796, %v1502_v14  ;;  %v1514_v23 = vadd.f32 0.001143296, %v1513_v15  ;;  %v1540_v34 = vmul.f32 %v3366_v25, %v3366_v25  ;;  %1869 = vmatpush.bf16.msrb.mxu0 %v2548_v0  ;;  %v2565_v15 = vld [vmem:[#allocation13 + $0xe0] sm:$0xff]  ;;  %1855 = vmatpush.bf16.msrb.mxu3 %v2541_v12 }
 0x997   : > { %v1464_v26 = vmul.f32 %v1463_v18, %v3348_v3  ;;  %v1475_v27 = vmul.f32 %v1474_v20, %v3348_v3  ;;  %v3372_v33 = vmin.f32 %v1420_v24, 16.0  ;;  %1894 = vmatpush.bf16.msrb.mxu2 %v2565_v15  ;;  %v2537_v12 = vld [vmem:[#allocation13] sm:$0xff] }
 0x998   : > { %v1504_v31 = vmul.f32 %v1503_v22, %v3352_v6  ;;  %v1515_v32 = vmul.f32 %v1514_v23, %v3352_v6  ;;  %v1371_v35 = vpop.f32.mrf.mxu3  ;;  %v3380_v46 = vmin.f32 %v1540_v34, 16.0  ;;  %v2547_v22 = vld [vmem:[#allocation13 + $0x50] sm:$0xff]  ;;  %v2564_v34 = vld [vmem:[#allocation13 + $0xd8] sm:$0xff] }
 0x999   : > { %v1465_v37 = vadd.f32 0.0036580483, %v1464_v26  ;;  %v1476_v38 = vadd.f32 0.014752088, %v1475_v27  ;;  %v1410_v39 = vpop.f32.mrf.mxu2  ;;  %v1422_v42 = vmul.f32 2.1237322e-06, %v3372_v33 }
 0x99a   : > { %v1505_v19 = vadd.f32 0.0036580483, %v1504_v31  ;;  %v1516_v41 = vadd.f32 0.014752088, %v1515_v32  ;;  %v1433_v45 = vmul.f32 3.8918573e-05, %v3372_v33  ;;  %1870 = vmatpush.bf16.msrb.mxu0 %v2547_v22 }
 0x99b   : > { %v1466_v43 = vmul.f32 %v1465_v37, %v3348_v3  ;;  %v1477_v44 = vmul.f32 %v1476_v38, %v3348_v3  ;;  %v1423_v50 = vadd.f32 0.00028619796, %v1422_v42  ;;  %v1542_v2 = vmul.f32 2.1237322e-06, %v3380_v46  ;;  %v2555_v23 = vld [vmem:[#allocation13 + $0x90] sm:$0xff]  ;;  %v2540_v31 = vld [vmem:[#allocation13 + $0x18] sm:$0xff]  ;;  %1895 = vmatpush.bf16.msrb.mxu2 %v2564_v34 }
 0x99c   : > { %v1506_v48 = vmul.f32 %v1505_v19, %v3352_v6  ;;  %v1517_v49 = vmul.f32 %v1516_v41, %v3352_v6  ;;  %v1434_v58 = vadd.f32 0.001143296, %v1433_v45  ;;  %v1553_v5 = vmul.f32 3.8918573e-05, %v3380_v46  ;;  %1883 = vmatpush.bf16.msrb.mxu1 %v2555_v23  ;;  %v2546_v38 = vld [vmem:[#allocation13 + $0x48] sm:$0xff]  ;;  %1856 = vmatpush.bf16.msrb.mxu3 %v2540_v31 }
 0x99d   : > { %v1467_v53 = vadd.f32 0.05243302, %v1466_v43  ;;  %v1478_v55 = vadd.f32 0.112945676, %v1477_v44  ;;  %v1424_v62 = vmul.f32 %v1423_v50, %v3372_v33  ;;  %v1543_v27 = vadd.f32 0.00028619796, %v1542_v2 }
 0x99e   : > { %v1507_v60 = vadd.f32 0.05243302, %v1506_v48  ;;  %v1518_v61 = vadd.f32 0.112945676, %v1517_v49  ;;  %v1435_v1 = vmul.f32 %v1434_v58, %v3372_v33  ;;  %v1554_v28 = vadd.f32 0.001143296, %v1553_v5  ;;  %1871 = vmatpush.bf16.msrb.mxu0 %v2546_v38 }
 0x99f   : > { %v1479_v63 = vmul.f32 %v1478_v55, %v3348_v3  ;;  %v1468_v10 = vmul.f32 %v1467_v53, %v3348_v3  ;;  %v1425_v21 = vadd.f32 0.0036580483, %v1424_v62  ;;  %v2554_v39 = vld [vmem:[#allocation13 + $0x88] sm:$0xff]  ;;  %v1544_v41 = vmul.f32 %v1543_v27, %v3380_v46  ;;  %v2539_v43 = vld [vmem:[#allocation13 + $0x10] sm:$0xff] }
 0x9a0   : > { %v1519_v11 = vmul.f32 %v1518_v61, %v3352_v6  ;;  %v1436_v14 = vadd.f32 0.014752088, %v1435_v1  ;;  %v1508_v18 = vmul.f32 %v1507_v60, %v3352_v6  ;;  %v1555_v37 = vmul.f32 %v1554_v28, %v3380_v46  ;;  %v2563_v44 = vld [vmem:[#allocation13 + $0xd0] sm:$0xff]  ;;  %1884 = vmatpush.bf16.msrb.mxu1 %v2554_v39  ;;  %1857 = vmatpush.bf16.msrb.mxu3 %v2539_v43  ;;  %v2538_v55 = vld [vmem:[#allocation13 + $0x8] sm:$0xff] }
 0x9a1   : > { %v1480_v13 = vadd.f32 0.4994258, %v1479_v63  ;;  %v1469_v29 = vadd.f32 0.18741608, %v1468_v10  ;;  %v1426_v19 = vmul.f32 %v1425_v21, %v3372_v33  ;;  %v1545_v50 = vadd.f32 0.0036580483, %v1544_v41  ;;  %1896 = vmatpush.bf16.msrb.mxu2 %v2563_v44 }
 0x9a2   : > { %v1520_v20 = vadd.f32 0.4994258, %v1519_v11  ;;  %v1437_v26 = vmul.f32 %v1436_v14, %v3372_v33  ;;  %v1509_v40 = vadd.f32 0.18741608, %v1508_v18  ;;  %v1556_v47 = vadd.f32 0.014752088, %v1555_v37  ;;  %1872 = vmatpush.bf16.msrb.mxu0 %v2545_v16 }
 0x9a3   : > { %v1481_v24 = vmul.f32 %v1480_v13, %v3348_v3  ;;  %v1470_v42 = vmul.f32 %v1469_v29, %v3348_v3  ;;  %v1427_v49 = vadd.f32 0.05243302, %v1426_v19  ;;  %v2562_v60 = vld [vmem:[#allocation13 + $0xc8] sm:$0xff]  ;;  %v1546_v11 = vmul.f32 %v1545_v50, %v3380_v46 }
 0x9a4   : > { %v1521_v30 = vmul.f32 %v1520_v20, %v3352_v6  ;;  %v1438_v36 = vadd.f32 0.112945676, %v1437_v26  ;;  %v1510_v48 = vmul.f32 %v1509_v40, %v3352_v6  ;;  %v1557_v3 = vmul.f32 %v1556_v47, %v3380_v46  ;;  %1885 = vmatpush.bf16.msrb.mxu1 %v2553_v51  ;;  %1858 = vmatpush.bf16.msrb.mxu3 %v2538_v55  ;;  %v2561_v20 = vld [vmem:[#allocation13 + $0xc0] sm:$0xff] }
 0x9a5   : > { %v3395_v32 = vadd.f32 1.0, %v1481_v24  ;;  %v1471_v52 = vadd.f32 1.1283791, %v1470_v42  ;;  %v1428_v2 = vmul.f32 %v1427_v49, %v3372_v33  ;;  %1897 = vmatpush.bf16.msrb.mxu2 %v2562_v60  ;;  %v1547_v28 = vadd.f32 0.05243302, %v1546_v11 }
 0x9a6   : > { %v3397_v35 = vadd.f32 1.0, %v1521_v30  ;;  %v1439_v45 = vmul.f32 %v1438_v36, %v3372_v33  ;;  %v1511_v6 = vadd.f32 1.1283791, %v1510_v48  ;;  %v1558_v5 = vadd.f32 0.112945676, %v1557_v3 }
 0x9a7   : > { %2714 = vrcp.f32 %v3395_v32  ;;  %v1472_v0 = vmul.f32 %v1471_v52, %v3339_v9  ;;  %v1492_v13 = vand.u32 2147483647, %v3395_v32  ;;  %v1494_v14 = vand.u32 2147483648, %v3395_v32 }
 0x9a8   : > { %2716 = vrcp.f32 %v3397_v35  ;;  %v1440_v53 = vadd.f32 0.4994258, %v1439_v45  ;;  %v1559_v18 = vmul.f32 %v1558_v5, %v3380_v46  ;;  %v1534_v22 = vand.u32 2147483648, %v3397_v35  ;;  %1859 = vmatpush.bf16.msrb.mxu3 %v2537_v12 }
 0x9a9   : > { %v1532_v23 = vand.u32 2147483647, %v3397_v35  ;;  %vm1488_vm13 = vweird.f32 %v3395_v32  ;;  %v1429_v27 = vadd.f32 0.18741608, %v1428_v2  ;;  %v1495_v29 = vor.u32 1.1754944e-38, %v1494_v14  ;;  %1898 = vmatpush.bf16.msrb.mxu2 %v2561_v20 }
 0x9aa   : > { %v1441_v63 = vmul.f32 %v1440_v53, %v3372_v33  ;;  %v1560_v24 = vadd.f32 0.4994258, %v1559_v18  ;;  %vm1528_vm15 = vweird.f32 %v3397_v35  ;;  %vm1493_vm0 = vcmp.eq.f32.partialorder %v1492_v13, 8.507059e+37 }
 0x9ab   : > { %v1512_v36 = vmul.f32 %v1511_v6, %v3342_v59  ;;  %v1535_v37 = vor.u32 1.1754944e-38, %v1534_v22  ;;  %vm1533_vm2 = vcmp.eq.f32.partialorder %v1532_v23, 8.507059e+37  ;;  %v1430_v42 = vmul.f32 %v1429_v27, %v3372_v33 }
 0x9ac   : > { %v3413_v10 = vadd.f32 1.0, %v1441_v63  ;;  %v1561_v31 = vmul.f32 %v1560_v24, %v3380_v46  ;;  %v1413_v59 = vmul.f32 0.5, %v3334_v54  ;;  %v1414_v47 = vmul.f32 0.5, %v3336_v56 }
 0x9ad   : > { %v2715_v58 = vpop.eup %2714  ;;  %v1431_v50 = vadd.f32 1.1283791, %v1430_v42  ;;  %v1415_v27 = vmul.f32 0.5, %v3354_v7 }
 0x9ae   : > { %v2717_v61 = vpop.eup %2716  ;;  %v1484_v62 = vmul.f32 %v2715_v58, %v3395_v32  ;;  %vm1489_vm11 = vweird.f32 %v2715_v58  ;;  %2718 = vrcp.f32 %v3413_v10  ;;  %v1562_v32 = vadd.f32 1.0, %v1561_v31 }
 0x9af   : > { %v1524_v1 = vmul.f32 %v2717_v61, %v3397_v35  ;;  %vm1529_vm12 = vweird.f32 %v2717_v61  ;;  %vm1490_vm14 = vmor %vm1488_vm13, %vm1489_vm11  ;;  %v1548_v35 = vmul.f32 %v1547_v28, %v3380_v46  ;;  %v1454_v51 = vand.u32 2147483648, %v3413_v10 }
 0x9b0   : > { %v1485_v8 = vsub.f32 1.0, %v1484_v62  ;;  %vm1530_vm1 = vmor %vm1528_vm15, %vm1529_vm12  ;;  %2720 = vrcp.f32 %v1562_v32  ;;  %v1452_v3 = vand.u32 2147483647, %v3413_v10  ;;  %vm1448_vm4 = vweird.f32 %v3413_v10 }
 0x9b1   : > { %v1525_v15 = vsub.f32 1.0, %v1524_v1  ;;  %v1549_v52 = vadd.f32 0.18741608, %v1548_v35  ;;  %v1455_v56 = vor.u32 1.1754944e-38, %v1454_v51  ;;  %v1432_v1 = vmul.f32 %v1431_v50, %v3361_v17 }
 0x9b2   : > { %v1486_v21 = vmul.f32 %v2715_v58, %v1485_v8  ;;  %vm1453_vm6 = vcmp.eq.f32.partialorder %v1452_v3, 8.507059e+37  ;;  %v1574_v11 = vand.u32 2147483648, %v1562_v32  ;;  %vm1568_vm8 = vweird.f32 %v1562_v32 }
 0x9b3   : > { %v1526_v9 = vmul.f32 %v2717_v61, %v1525_v15  ;;  %v1550_v62 = vmul.f32 %v1549_v52, %v3380_v46  ;;  %v1412_v46 = vmul.f32 0.5, %v3350_v4 }
 0x9b4   : > { %v1487_v26 = vadd.f32 %v2715_v58, %v1486_v21  ;;  %v2719_v40 = vpop.eup %2718  ;;  %v1575_v17 = vor.u32 1.1754944e-38, %v1574_v11 }
 0x9b5   : > { %v1527_v30 = vadd.f32 %v2717_v61, %v1526_v9  ;;  %v1444_v44 = vmul.f32 %v2719_v40, %v3413_v10  ;;  %vm1449_vm3 = vweird.f32 %v2719_v40  ;;  %v1551_v12 = vadd.f32 1.1283791, %v1550_v62 }
 0x9b6   : > { %v1491_v34 = vsel %vm1490_vm14, %v2715_v58, %v1487_v26  ;;  %v2721_v58 = vpop.eup %2720  ;;  %vm1450_vm5 = vmor %vm1448_vm4, %vm1449_vm3  ;;  %v1572_v10 = vand.u32 2147483647, %v1562_v32 }
 0x9b7   : > { %v1496_v38 = vsel %vm1493_vm0, %v1495_v29, %v1491_v34  ;;  %v1531_v39 = vsel %vm1530_vm1, %v2717_v61, %v1527_v30  ;;  %v1445_v48 = vsub.f32 1.0, %v1444_v44  ;;  %v1564_v63 = vmul.f32 %v2721_v58, %v1562_v32 }
 0x9b8   : > { %v1497_v19 = vmul.f32 %v1496_v38, %v1472_v0  ;;  %v1536_v41 = vsel %vm1533_vm2, %v1535_v37, %v1531_v39  ;;  %vm1569_vm7 = vweird.f32 %v2721_v58  ;;  %v1552_v20 = vmul.f32 %v1551_v12, %v3366_v25 }
 0x9b9   : > { %v1537_v43 = vmul.f32 %v1536_v41, %v1512_v36  ;;  %v1446_v33 = vmul.f32 %v2719_v40, %v1445_v48  ;;  %v1565_v0 = vsub.f32 1.0, %v1564_v63  ;;  %vm1570_vm9 = vmor %vm1568_vm8, %vm1569_vm7  ;;  %vm1573_vm10 = vcmp.eq.f32.partialorder %v1572_v10, 8.507059e+37  ;;  %v2691_v36 = vld [vmem:[%s3490_s11] ss:$0 sm:$0xff] }
 0x9ba   : > { %v2338_v45 = vclamps-f32 %v1497_v19, 1.0 }
 0x9bb   : > { %v2339_v16 = vclamps-f32 %v1537_v43, 1.0  ;;  %v1447_v61 = vadd.f32 %v2719_v40, %v1446_v33  ;;  %v1566_v13 = vmul.f32 %v2721_v58, %v1565_v0 }
 0x9bc   : > { %v1581_v49 = vadd.f32 1.0, %v2338_v45 }
 0x9bd   : > { %v1582_v53 = vadd.f32 1.0, %v2339_v16  ;;  %v1451_v2 = vsel %vm1450_vm5, %v2719_v40, %v1447_v61  ;;  %v1567_v15 = vadd.f32 %v2721_v58, %v1566_v13 }
 0x9be   : > { %v1585_v55 = vmul.f32 %v1581_v49, %v1413_v59  ;;  %v1456_v5 = vsel %vm1453_vm6, %v1455_v56, %v1451_v2 }
 0x9bf   : > { %v1586_v60 = vmul.f32 %v1582_v53, %v1414_v47  ;;  %v1457_v8 = vmul.f32 %v1456_v5, %v1432_v1  ;;  %v1571_v21 = vsel %vm1570_vm9, %v2721_v58, %v1567_v15 }
 0x9c0   : > { %v1589_v54 = vpack.c.bf16 %v1585_v55, %v1585_v55  ;;  %v1576_v9 = vsel %vm1573_vm10, %v1575_v17, %v1571_v21 }
 0x9c1   : > { %v1590_v6 = vpack.c.bf16 %v1586_v60, %v1586_v60  ;;  %v2337_v14 = vclamps-f32 %v1457_v8, 1.0  ;;  %v1577_v23 = vmul.f32 %v1576_v9, %v1552_v20 }
 0x9c2   : > { %1873 = vmatmul.bf16.vlgmr.msrb.gmra.mxu0 %v1589_v54 }
 0x9c3   : > { %1886 = vmatmul.bf16.vlgmr.msrb.gmra.mxu1 %v1590_v6  ;;  %v1580_v18 = vadd.f32 1.0, %v2337_v14  ;;  %v2340_v26 = vclamps-f32 %v1577_v23, 1.0 }
 0x9c5   : > { %v1584_v22 = vmul.f32 %v1580_v18, %v1412_v46  ;;  %v1583_v28 = vadd.f32 1.0, %v2340_v26 }
 0x9c7   : > { %v1588_v24 = vpack.c.bf16 %v1584_v22, %v1584_v22  ;;  %v1587_v29 = vmul.f32 %v1583_v28, %v1415_v27 }
 0x9c9   : > { %1860 = vmatmul.bf16.vlgmr.msrb.gmra.mxu3 %v1588_v24  ;;  %v1591_v4 = vpack.c.bf16 %v1587_v29, %v1587_v29 }
 0x9cb   : > { %1899 = vmatmul.bf16.vlgmr.msrb.gmra.mxu2 %v1591_v4 }
 0xa3f   : > { %v1874_v30 = vpop.f32.mrf.mxu0 }
 0xa40   : > { %v1887_v31 = vpop.f32.mrf.mxu1 }
 0xa47   : > { %v1876_v34 = vpop.f32.mrf.mxu0 }
 0xa48   : > { %v1889_v25 = vpop.f32.mrf.mxu1 }
 0xa4c   : > { %v1861_v37 = vpop.f32.mrf.mxu3 }
 0xa4d   : > { %v1862_v38 = vadd.f32 %v2691_v36, %v1861_v37 }
 0xa4e   : > { %v1900_v32 = vpop.f32.mrf.mxu2 }
 0xa4f   : > { %v1875_v39 = vadd.f32 %v1874_v30, %v1862_v38 }
 0xa51   : > { %v1888_v7 = vadd.f32 %v1887_v31, %v1875_v39 }
 0xa53   : > { %v1901_v40 = vadd.f32 %v1900_v32, %v1888_v7 }
 0xa54   : > { %v1863_v19 = vpop.f32.mrf.mxu3 }
 0xa55   : > { %v1904_v41 = vadd.f32 %v1901_v40, %v3317_v57 }
 0xa57   : > { %1905 = vst [vmem:[%s525_s20] sm:$0xff] %v1904_v41 }
 0xa58   : > { %2959 = shalt.err (!%p2956_p9)
}
 0xa59   : > { %2595 = dma.vmem_to_hbm [thread:$0]  (%p3196_p5), %s1920_s4, 128, %s1922_s26, %s1907_s28   ;;  %v1902_v57 = vpop.f32.mrf.mxu2 }
 0xa5a PF: > { %s1933_s25 = sand.u32 1, %s2998_s21   ;;  %p3514_p10 = scmp.ge.s32.totalorder %s3010_s24, 2 }
 0xa5b   : > { %s1934_s8 = scalar_lea.sflag [#allocation4], %s1933_s25 }
 0xa5c   : > { %p2621_p13 = pnand %p3514_p10, %p3200_p6 }
 0xa5e   : > { %p2622_p11 = pneg %p2621_p13 }
 0xa60   : > { %2993 = dma.done.wait (%p2622_p11), %s1934_s8, 128  }
 0xa61   : > { %2995 = vsyncadd (%p2622_p11), %s1934_s8, 4294967168  ;;  %p28_p0 = scmp.ge.s32.totalorder %s3170_s30, 4   ;;  %s3515_s21 = smov %s3002_s22 }
 0xa62   : > { %s3516_s22 = smov %s3006_s23  ;;  %s3517_s23 = smov %s3181_s18 }
 0xa63   : > { %s3518_s24 = smov %s3170_s30  ;;  %30 = sbr.rel (!%p28_p0) target bundleno = 16 (0x10), region = 137 }
 0xa68   :  { %1940 = vsyncpa [#allocation3], 1 }
 0xa69   :  { %1942 = vsyncpa [#allocation3 + $0x1], 1 }
 0xa6a   :  { %1943 = vsyncpa [#allocation6], 1 }
 0xa6b   :  { %1944 = vsyncpa [#allocation9], 1 }
 0xa6c   :  { %1945 = vsyncpa [#allocation12], 1 }
 0xa6d   :  { %1946 = vsyncpa [#allocation4], 1 }
 0xa6e   :  { %1948 = vsyncpa [#allocation4 + $0x1], 1 }

</bundles_post_ra>
